<compile_context>
chip_gen: v7x
topology: tpu7x:2x2x1
jax: 0.10.0
libtpu: 0.0.40
codegen_flags: <defaults>
</compile_context>

<pallas_src>
import functools

import jax
import jax.numpy as jnp
from jax import lax
from jax.experimental import pallas as pl
from jax.experimental.pallas import tpu as pltpu


# ----------------------------------------------------------------------------
# helpers
# ----------------------------------------------------------------------------
def _layer_norm_f32(x, g, b, eps):
    """LayerNorm with one pass over x (sum + sum-of-squares), biased variance."""
    d = x.shape[-1]
    inv_d = 1.0 / float(d)
    s1 = jnp.sum(x, axis=-1, keepdims=True)
    s2 = jnp.sum(x * x, axis=-1, keepdims=True)
    mu = s1 * inv_d
    var = jnp.maximum(s2 * inv_d - mu * mu, 0.0)
    return (x - mu) * lax.rsqrt(var + eps) * g + b


def _pick_block_q(s, block_q):
    """Largest divisor of S that is a multiple of 8 and <= block_q, else S."""
    bq = min(block_q, s)
    for t in range(bq, 7, -1):
        if s % t == 0 and t % 8 == 0:
            return t
    return s


# ----------------------------------------------------------------------------
# kernel 1: LayerNorm1 + fused QK projection + V projection  (grid = (B, S//TQ))
# ----------------------------------------------------------------------------
def _qkv_kernel(src_ref, pos_ref, wqk_ref, bqk_ref, wv_ref, bv_ref,
                g1_ref, be1_ref, q_ref, k_ref, v_ref, *, nhead, eps):
    f32, bf16 = jnp.float32, jnp.bfloat16
    x = src_ref[0].astype(f32)                               # (TQ, D)
    p = pos_ref[0].astype(f32)                               # (TQ, D)
    d = x.shape[-1]
    scale = 1.0 / float(d // nhead) ** 0.5                   # PyTorch scales q

    xn = _layer_norm_f32(x, g1_ref[...], be1_ref[...], eps)  # (TQ, D)
    qk_in = (xn + p).astype(bf16)                            # q/k input (with pos)

    # One N=2D matmul for [q|k]; lane slices at 0 / D are 128-aligned at D=256.
    qk = jnp.dot(qk_in, wqk_ref[...], preferred_element_type=f32) + bqk_ref[...]
    q_ref[0] = (qk[:, :d] * scale).astype(q_ref.dtype)
    k_ref[0] = qk[:, d:].astype(k_ref.dtype)

    v = jnp.dot(xn.astype(bf16), wv_ref[...],
                preferred_element_type=f32) + bv_ref[...]
    v_ref[0] = v.astype(v_ref.dtype)


# ----------------------------------------------------------------------------
# kernel 2: per-query-block attention + out-proj + LN2 + FFN (grid = (B, S//TQ))
# ----------------------------------------------------------------------------
def _attn_ffn_kernel(src_ref, q_ref, k_ref, v_ref, wo_ref, bo_ref,
                     g2_ref, be2_ref, w1_ref, b1_ref, w2_ref, b2_ref,
                     out_ref, *, nhead, eps):
    f32, bf16 = jnp.float32, jnp.bfloat16
    src = src_ref[0].astype(f32)                             # (TQ, D)
    q = q_ref[0]                                             # (TQ, D) bf16 (pre-scaled)
    k = k_ref[0]                                             # (S,  D) bf16
    v = v_ref[0]                                             # (S,  D) bf16
    d = q.shape[-1]
    hd = d // nhead

    # Static head loop: with query tiling only (TQ, S) score state is live per
    # head, and the only value carried between heads is a (TQ, Hd) output, so
    # the unroll stays register/VMEM friendly. Head outputs are concatenated
    # once and fed to a single full-width (K = D) out-projection matmul.
    heads = []
    for h in range(nhead):
        lo = h * hd
        qh = q[:, lo:lo + hd]
        kh = k[:, lo:lo + hd]
        vh = v[:, lo:lo + hd]
        s = lax.dot_general(qh, kh, (((1,), (1,)), ((), ())),
                            preferred_element_type=f32)      # (TQ, S)
        m = jnp.max(s, axis=-1, keepdims=True)
        e = jnp.exp(s - m)
        denom = jnp.sum(e, axis=-1, keepdims=True)
        attn = (e * pl.reciprocal(denom, approx=True)).astype(bf16)
        heads.append(jnp.dot(attn, vh, preferred_element_type=f32).astype(bf16))
    o = jnp.concatenate(heads, axis=-1)                      # (TQ, D) bf16

    attn_out = jnp.dot(o, wo_ref[...], preferred_element_type=f32) + bo_ref[...]
    x = src + attn_out                                       # residual (dropout1 = id)

    xn2 = _layer_norm_f32(x, g2_ref[...], be2_ref[...], eps).astype(bf16)
    h1 = jnp.maximum(
        jnp.dot(xn2, w1_ref[...], preferred_element_type=f32) + b1_ref[...],
        0.0).astype(bf16)                                    # ReLU
    ff = jnp.dot(h1, w2_ref[...], preferred_element_type=f32) + b2_ref[...]
    out_ref[0] = (x + ff).astype(out_ref.dtype)              # residual (dropout2 = id)


# ----------------------------------------------------------------------------
# wrapper
# ----------------------------------------------------------------------------
def prepare_encoder_layer_params(params):
    """One-time weight staging: transpose to (in, out), bf16 matmul operands,
    fuse Wq|Wk, f32 row biases. Call once outside the per-step hot path."""
    f32, bf16 = jnp.float32, jnp.bfloat16
    row = lambda a: jnp.asarray(a, f32).reshape(1, -1)
    t = lambda a: jnp.asarray(a).T.astype(bf16)
    return dict(
        wqk=jnp.concatenate([jnp.asarray(params["wq"]).T,
                             jnp.asarray(params["wk"]).T], axis=1).astype(bf16),
        bqk=jnp.concatenate([jnp.asarray(params["bq"]),
                             jnp.asarray(params["bk"])]).astype(f32).reshape(1, -1),
        wv=t(params["wv"]), bv=row(params["bv"]),
        wo=t(params["wo"]), bo=row(params["bo"]),
        g1=row(params["g1"]), be1=row(params["be1"]),
        g2=row(params["g2"]), be2=row(params["be2"]),
        w1=t(params["w1"]), b1=row(params["b1"]),
        w2=t(params["w2"]), b2=row(params["b2"]),
    )


def transformer_encoder_layer_forward(src, pos, prepared, *, nhead, eps=1e-5,
                                      block_q=128):
    """Pallas equivalent of TransformerEncoderLayer.forward (pre-norm, eval).

    src: (S, B, D) float32; pos: (S, B, D) float32 or None. Returns (S, B, D).
    """
    S, B, D = src.shape
    assert D % nhead == 0
    if pos is None:
        pos = jnp.zeros_like(src)

    TQ = _pick_block_q(S, block_q)
    n_q = S // TQ

    # TODO(synk): for production, keep activations batch-major (B, S, D) in the
    # surrounding model so these transposes (extra HBM round trips) disappear.
    src_b = jnp.transpose(src, (1, 0, 2)).astype(jnp.float32)
    pos_b = jnp.transpose(pos, (1, 0, 2)).astype(jnp.float32)

    row_spec = pl.BlockSpec((1, TQ, D), lambda b, i: (b, i, 0))
    seq_spec = pl.BlockSpec((1, S, D), lambda b, i: (b, 0, 0))
    cparams = pltpu.CompilerParams(
        dimension_semantics=("parallel", "parallel"))

    def resident(a, buffered):
        # Constant index_map -> weight stays resident; request 1 buffer.
        if buffered:
            return pl.BlockSpec(a.shape, lambda b, i: (0, 0),
                                pipeline_mode=pl.Buffered(1))
        return pl.BlockSpec(a.shape, lambda b, i: (0, 0))

    def run(buffered):
        w = lambda a: resident(a, buffered)

        qkv_args = (src_b, pos_b, prepared["wqk"], prepared["bqk"],
                    prepared["wv"], prepared["bv"],
                    prepared["g1"], prepared["be1"])
        q, k, v = pl.pallas_call(
            functools.partial(_qkv_kernel, nhead=nhead, eps=eps),
            grid=(B, n_q),
            in_specs=[row_spec, row_spec] + [w(a) for a in qkv_args[2:]],
            out_specs=[row_spec, row_spec, row_spec],
            out_shape=[jax.ShapeDtypeStruct((B, S, D), jnp.bfloat16)] * 3,
            compiler_params=cparams,
        )(*qkv_args)

        attn_args = (src_b, q, k, v, prepared["wo"], prepared["bo"],
                     prepared["g2"], prepared["be2"],
                     prepared["w1"], prepared["b1"],
                     prepared["w2"], prepared["b2"])
        out_b = pl.pallas_call(
            functools.partial(_attn_ffn_kernel, nhead=nhead, eps=eps),
            grid=(B, n_q),
            in_specs=[row_spec, row_spec, seq_spec, seq_spec]
                     + [w(a) for a in attn_args[4:]],
            out_specs=row_spec,
            out_shape=jax.ShapeDtypeStruct((B, S, D), jnp.float32),
            compiler_params=cparams,
        )(*attn_args)
        return out_b

    try:
        out_b = run(True)          # single-buffered resident weights
    except Exception:              # pipeline_mode unsupported on this JAX
        out_b = run(False)
    return jnp.transpose(out_b, (1, 0, 2))


# ----------------------------------------------------------------------------
# pure-JAX reference (mirrors PyTorch forward_pre in eval mode, all f32)
# ----------------------------------------------------------------------------
def _reference(src, pos, P, nhead, eps=1e-5):
    S, B, D = src.shape
    Hd = D // nhead

    def ln(x, g, b):
        mu = x.mean(-1, keepdims=True)
        xc = x - mu
        var = (xc * xc).mean(-1, keepdims=True)
        return xc / jnp.sqrt(var + eps) * g + b

    x = src
    xn = ln(x, P["g1"], P["be1"])
    qk = xn + pos
    q = qk @ P["wq"].T + P["bq"]
    k = qk @ P["wk"].T + P["bk"]
    v = xn @ P["wv"].T + P["bv"]

    def split(t):  # (S, B, D) -> (B, H, S, Hd)
        return t.reshape(S, B, nhead, Hd).transpose(1, 2, 0, 3)

    qh = split(q * (1.0 / jnp.sqrt(jnp.float32(Hd))))
    kh, vh = split(k), split(v)
    scores = jnp.einsum("bhsd,bhtd->bhst", qh, kh)
    m = scores.max(-1, keepdims=True)
    e = jnp.exp(scores - m)
    attn = e / e.sum(-1, keepdims=True)
    o = jnp.einsum("bhst,bhtd->bhsd", attn, vh)
    o = o.transpose(2, 0, 1, 3).reshape(S, B, D)
    x = x + (o @ P["wo"].T + P["bo"])
    xn2 = ln(x, P["g2"], P["be2"])
    ff = jnp.maximum(xn2 @ P["w1"].T + P["b1"], 0.0) @ P["w2"].T + P["b2"]
    return x + ff


if __name__ == "__main__":
    S, B, D, H, F = 16, 2, 32, 4, 64   # seq, batch, d_model, nhead, dim_feedforward
    key = jax.random.PRNGKey(0)
    ks = jax.random.split(key, 18)

    def w(k, shape, scale=0.1):
        return scale * jax.random.normal(k, shape, dtype=jnp.float32)

    params = dict(
        wq=w(ks[0], (D, D)), bq=w(ks[1], (D,)),
        wk=w(ks[2], (D, D)), bk=w(ks[3], (D,)),
        wv=w(ks[4], (D, D)), bv=w(ks[5], (D,)),
        wo=w(ks[6], (D, D)), bo=w(ks[7], (D,)),
        g1=1.0 + w(ks[8], (D,)), be1=w(ks[9], (D,)),
        g2=1.0 + w(ks[10], (D,)), be2=w(ks[11], (D,)),
        w1=w(ks[12], (F, D)), b1=w(ks[13], (F,)),
        w2=w(ks[14], (D, F)), b2=w(ks[15], (D,)),
    )
    src = jax.random.normal(ks[16], (S, B, D), dtype=jnp.float32)
    pos = jax.random.normal(ks[17], (S, B, D), dtype=jnp.float32)

    prepared = prepare_encoder_layer_params(params)
    # block_q=8 -> grid (B=2, S//TQ=2): exercises both grid axes and the
    # query-tiled attention path even at these toy shapes.
    out = transformer_encoder_layer_forward(src, pos, prepared, nhead=H,
                                            block_q=8)
    jax.block_until_ready(out)

    ref = _reference(src, pos, params, nhead=H)
    assert out.shape == (S, B, D)
    max_err = float(jnp.max(jnp.abs(out - ref)))
    # bf16 matmul operands (f32 accumulation) -> looser tolerance than all-f32.
    assert jnp.allclose(out, ref, atol=5e-2, rtol=5e-2), (
        f"Pallas output does not match reference: max err {max_err}")

    print("KERNEL_OK")
</pallas_src>

<mosaic_0001>
module attributes {stable_mosaic.version = 11 : i64} {
  func.func @_qkv_kernel(%arg0: i32, %arg1: i32, %arg2: memref<1x8x32xf32, #tpu.memory_space<vmem>>, %arg3: memref<1x8x32xf32, #tpu.memory_space<vmem>>, %arg4: memref<32x64xbf16, #tpu.memory_space<vmem>>, %arg5: memref<1x64xf32, #tpu.memory_space<vmem>>, %arg6: memref<32x32xbf16, #tpu.memory_space<vmem>>, %arg7: memref<1x32xf32, #tpu.memory_space<vmem>>, %arg8: memref<1x32xf32, #tpu.memory_space<vmem>>, %arg9: memref<1x32xf32, #tpu.memory_space<vmem>>, %arg10: memref<1x8x32xbf16, #tpu.memory_space<vmem>>, %arg11: memref<1x8x32xbf16, #tpu.memory_space<vmem>>, %arg12: memref<1x8x32xbf16, #tpu.memory_space<vmem>>) attributes {dimension_semantics = [#tpu.dimension_semantics<parallel>, #tpu.dimension_semantics<parallel>], iteration_bounds = array<i64: 2, 2>, scalar_prefetch = 0 : i64, scratch_operands = 0 : i64, tpu.core_type = #tpu.core_type<tc>, window_params = [{transform_indices = @transform_0, window_bounds = array<i64: 1, 8, 32>}, {transform_indices = @transform_1, window_bounds = array<i64: 1, 8, 32>}, {pipeline_mode = #tpu.pipeline_mode<synchronous>, transform_indices = @transform_2, window_bounds = array<i64: 32, 64>}, {pipeline_mode = #tpu.pipeline_mode<synchronous>, transform_indices = @transform_3, window_bounds = array<i64: 1, 64>}, {pipeline_mode = #tpu.pipeline_mode<synchronous>, transform_indices = @transform_4, window_bounds = array<i64: 32, 32>}, {pipeline_mode = #tpu.pipeline_mode<synchronous>, transform_indices = @transform_5, window_bounds = array<i64: 1, 32>}, {pipeline_mode = #tpu.pipeline_mode<synchronous>, transform_indices = @transform_6, window_bounds = array<i64: 1, 32>}, {pipeline_mode = #tpu.pipeline_mode<synchronous>, transform_indices = @transform_7, window_bounds = array<i64: 1, 32>}, {transform_indices = @transform_8, window_bounds = array<i64: 1, 8, 32>}, {transform_indices = @transform_9, window_bounds = array<i64: 1, 8, 32>}, {transform_indices = @transform_10, window_bounds = array<i64: 1, 8, 32>}]} {
    %c0 = arith.constant 0 : index
    %c0_0 = arith.constant 0 : index
    %c0_1 = arith.constant 0 : index
    %0 = vector.load %arg2[%c0, %c0_0, %c0_1] : memref<1x8x32xf32, #tpu.memory_space<vmem>>, vector<1x8x32xf32>
    %1 = vector.shape_cast %0 : vector<1x8x32xf32> to vector<8x32xf32>
    %c0_2 = arith.constant 0 : index
    %c0_3 = arith.constant 0 : index
    %c0_4 = arith.constant 0 : index
    %2 = vector.load %arg3[%c0_2, %c0_3, %c0_4] : memref<1x8x32xf32, #tpu.memory_space<vmem>>, vector<1x8x32xf32>
    %3 = vector.shape_cast %2 : vector<1x8x32xf32> to vector<8x32xf32>
    %c0_5 = arith.constant 0 : index
    %c0_6 = arith.constant 0 : index
    %4 = vector.load %arg8[%c0_5, %c0_6] : memref<1x32xf32, #tpu.memory_space<vmem>>, vector<1x32xf32>
    %c0_7 = arith.constant 0 : index
    %c0_8 = arith.constant 0 : index
    %5 = vector.load %arg9[%c0_7, %c0_8] : memref<1x32xf32, #tpu.memory_space<vmem>>, vector<1x32xf32>
    %cst = arith.constant dense<0.000000e+00> : vector<8xf32>
    %6 = vector.multi_reduction <add>, %1, %cst [1] : vector<8x32xf32> to vector<8xf32>
    %7 = vector.shape_cast %6 : vector<8xf32> to vector<8x1xf32>
    %8 = arith.mulf %1, %1 : vector<8x32xf32>
    %cst_9 = arith.constant dense<0.000000e+00> : vector<8xf32>
    %9 = vector.multi_reduction <add>, %8, %cst_9 [1] : vector<8x32xf32> to vector<8xf32>
    %10 = vector.shape_cast %9 : vector<8xf32> to vector<8x1xf32>
    %cst_10 = arith.constant 3.125000e-02 : f32
    %11 = vector.broadcast %cst_10 : f32 to vector<8x1xf32>
    %12 = arith.mulf %7, %11 : vector<8x1xf32>
    %cst_11 = arith.constant 3.125000e-02 : f32
    %13 = vector.broadcast %cst_11 : f32 to vector<8x1xf32>
    %14 = arith.mulf %10, %13 : vector<8x1xf32>
    %15 = arith.mulf %12, %12 : vector<8x1xf32>
    %16 = arith.subf %14, %15 : vector<8x1xf32>
    %cst_12 = arith.constant 0.000000e+00 : f32
    %17 = vector.broadcast %cst_12 : f32 to vector<8x1xf32>
    %18 = arith.maximumf %16, %17 : vector<8x1xf32>
    %19 = vector.broadcast %12 : vector<8x1xf32> to vector<8x32xf32>
    %20 = arith.subf %1, %19 : vector<8x32xf32>
    %cst_13 = arith.constant 9.99999974E-6 : f32
    %21 = vector.broadcast %cst_13 : f32 to vector<8x1xf32>
    %22 = arith.addf %18, %21 : vector<8x1xf32>
    %23 = math.rsqrt %22 : vector<8x1xf32>
    %24 = vector.broadcast %23 : vector<8x1xf32> to vector<8x32xf32>
    %25 = arith.mulf %20, %24 : vector<8x32xf32>
    %26 = vector.broadcast %4 : vector<1x32xf32> to vector<8x32xf32>
    %27 = arith.mulf %25, %26 : vector<8x32xf32>
    %28 = vector.broadcast %5 : vector<1x32xf32> to vector<8x32xf32>
    %29 = arith.addf %27, %28 : vector<8x32xf32>
    %30 = arith.addf %29, %3 : vector<8x32xf32>
    %31 = arith.truncf %30 : vector<8x32xf32> to vector<8x32xbf16>
    %c0_14 = arith.constant 0 : index
    %c0_15 = arith.constant 0 : index
    %32 = vector.load %arg4[%c0_14, %c0_15] : memref<32x64xbf16, #tpu.memory_space<vmem>>, vector<32x64xbf16>
    %cst_16 = arith.constant dense<0.000000e+00> : vector<8x64xf32>
    %33 = tpu.matmul %31, %32, %cst_16 {dimension_numbers = #tpu.dot_dimension_numbers<[1], [0], [0], [1], [0, 0, 1, 1], [], []>} : vector<8x32xbf16>, vector<32x64xbf16>, vector<8x64xf32> -> vector<8x64xf32>
    %c0_17 = arith.constant 0 : index
    %c0_18 = arith.constant 0 : index
    %34 = vector.load %arg5[%c0_17, %c0_18] : memref<1x64xf32, #tpu.memory_space<vmem>>, vector<1x64xf32>
    %35 = vector.broadcast %34 : vector<1x64xf32> to vector<8x64xf32>
    %36 = arith.addf %33, %35 : vector<8x64xf32>
    %37 = vector.extract_strided_slice %36 {offsets = [0, 0], sizes = [8, 32], strides = [1, 1]} : vector<8x64xf32> to vector<8x32xf32>
    %cst_19 = arith.constant 0.353553385 : f32
    %38 = vector.broadcast %cst_19 : f32 to vector<8x32xf32>
    %39 = arith.mulf %37, %38 : vector<8x32xf32>
    %40 = arith.truncf %39 : vector<8x32xf32> to vector<8x32xbf16>
    %c0_20 = arith.constant 0 : index
    %c0_21 = arith.constant 0 : index
    %c0_22 = arith.constant 0 : index
    %41 = vector.load %arg10[%c0_20, %c0_21, %c0_22] : memref<1x8x32xbf16, #tpu.memory_space<vmem>>, vector<1x8x32xbf16>
    %42 = vector.shape_cast %41 : vector<1x8x32xbf16> to vector<8x32xbf16>
    %43 = vector.shape_cast %40 : vector<8x32xbf16> to vector<1x8x32xbf16>
    tpu.vector_store %arg10[%c0_20, %c0_21, %c0_22], %43 {strides = array<i32>} : memref<1x8x32xbf16, #tpu.memory_space<vmem>>, vector<1x8x32xbf16>,
    %44 = vector.extract_strided_slice %36 {offsets = [0, 32], sizes = [8, 32], strides = [1, 1]} : vector<8x64xf32> to vector<8x32xf32>
    %45 = arith.truncf %44 : vector<8x32xf32> to vector<8x32xbf16>
    %c0_23 = arith.constant 0 : index
    %c0_24 = arith.constant 0 : index
    %c0_25 = arith.constant 0 : index
    %46 = vector.load %arg11[%c0_23, %c0_24, %c0_25] : memref<1x8x32xbf16, #tpu.memory_space<vmem>>, vector<1x8x32xbf16>
    %47 = vector.shape_cast %46 : vector<1x8x32xbf16> to vector<8x32xbf16>
    %48 = vector.shape_cast %45 : vector<8x32xbf16> to vector<1x8x32xbf16>
    tpu.vector_store %arg11[%c0_23, %c0_24, %c0_25], %48 {strides = array<i32>} : memref<1x8x32xbf16, #tpu.memory_space<vmem>>, vector<1x8x32xbf16>,
    %49 = arith.truncf %29 : vector<8x32xf32> to vector<8x32xbf16>
    %c0_26 = arith.constant 0 : index
    %c0_27 = arith.constant 0 : index
    %50 = vector.load %arg6[%c0_26, %c0_27] : memref<32x32xbf16, #tpu.memory_space<vmem>>, vector<32x32xbf16>
    %cst_28 = arith.constant dense<0.000000e+00> : vector<8x32xf32>
    %51 = tpu.matmul %49, %50, %cst_28 {dimension_numbers = #tpu.dot_dimension_numbers<[1], [0], [0], [1], [0, 0, 1, 1], [], []>} : vector<8x32xbf16>, vector<32x32xbf16>, vector<8x32xf32> -> vector<8x32xf32>
    %c0_29 = arith.constant 0 : index
    %c0_30 = arith.constant 0 : index
    %52 = vector.load %arg7[%c0_29, %c0_30] : memref<1x32xf32, #tpu.memory_space<vmem>>, vector<1x32xf32>
    %53 = vector.broadcast %52 : vector<1x32xf32> to vector<8x32xf32>
    %54 = arith.addf %51, %53 : vector<8x32xf32>
    %55 = arith.truncf %54 : vector<8x32xf32> to vector<8x32xbf16>
    %c0_31 = arith.constant 0 : index
    %c0_32 = arith.constant 0 : index
    %c0_33 = arith.constant 0 : index
    %56 = vector.load %arg12[%c0_31, %c0_32, %c0_33] : memref<1x8x32xbf16, #tpu.memory_space<vmem>>, vector<1x8x32xbf16>
    %57 = vector.shape_cast %56 : vector<1x8x32xbf16> to vector<8x32xbf16>
    %58 = vector.shape_cast %55 : vector<8x32xbf16> to vector<1x8x32xbf16>
    tpu.vector_store %arg12[%c0_31, %c0_32, %c0_33], %58 {strides = array<i32>} : memref<1x8x32xbf16, #tpu.memory_space<vmem>>, vector<1x8x32xbf16>,
    return
  }
  func.func @transform_0(%arg0: i32, %arg1: i32) -> (i32, i32, i32) {
    %c0_i32 = arith.constant 0 : i32
    %c0_i32_0 = arith.constant 0 : i32
    return %arg0, %arg1, %c0_i32 : i32, i32, i32
  }
  func.func @transform_1(%arg0: i32, %arg1: i32) -> (i32, i32, i32) {
    %c0_i32 = arith.constant 0 : i32
    %c0_i32_0 = arith.constant 0 : i32
    return %arg0, %arg1, %c0_i32 : i32, i32, i32
  }
  func.func @transform_2(%arg0: i32, %arg1: i32) -> (i32, i32) {
    %c0_i32 = arith.constant 0 : i32
    %c0_i32_0 = arith.constant 0 : i32
    %c0_i32_1 = arith.constant 0 : i32
    return %c0_i32, %c0_i32_0 : i32, i32
  }
  func.func @transform_3(%arg0: i32, %arg1: i32) -> (i32, i32) {
    %c0_i32 = arith.constant 0 : i32
    %c0_i32_0 = arith.constant 0 : i32
    %c0_i32_1 = arith.constant 0 : i32
    return %c0_i32, %c0_i32_0 : i32, i32
  }
  func.func @transform_4(%arg0: i32, %arg1: i32) -> (i32, i32) {
    %c0_i32 = arith.constant 0 : i32
    %c0_i32_0 = arith.constant 0 : i32
    %c0_i32_1 = arith.constant 0 : i32
    return %c0_i32, %c0_i32_0 : i32, i32
  }
  func.func @transform_5(%arg0: i32, %arg1: i32) -> (i32, i32) {
    %c0_i32 = arith.constant 0 : i32
    %c0_i32_0 = arith.constant 0 : i32
    %c0_i32_1 = arith.constant 0 : i32
    return %c0_i32, %c0_i32_0 : i32, i32
  }
  func.func @transform_6(%arg0: i32, %arg1: i32) -> (i32, i32) {
    %c0_i32 = arith.constant 0 : i32
    %c0_i32_0 = arith.constant 0 : i32
    %c0_i32_1 = arith.constant 0 : i32
    return %c0_i32, %c0_i32_0 : i32, i32
  }
  func.func @transform_7(%arg0: i32, %arg1: i32) -> (i32, i32) {
    %c0_i32 = arith.constant 0 : i32
    %c0_i32_0 = arith.constant 0 : i32
    %c0_i32_1 = arith.constant 0 : i32
    return %c0_i32, %c0_i32_0 : i32, i32
  }
  func.func @transform_8(%arg0: i32, %arg1: i32) -> (i32, i32, i32) {
    %c0_i32 = arith.constant 0 : i32
    %c0_i32_0 = arith.constant 0 : i32
    return %arg0, %arg1, %c0_i32 : i32, i32, i32
  }
  func.func @transform_9(%arg0: i32, %arg1: i32) -> (i32, i32, i32) {
    %c0_i32 = arith.constant 0 : i32
    %c0_i32_0 = arith.constant 0 : i32
    return %arg0, %arg1, %c0_i32 : i32, i32, i32
  }
  func.func @transform_10(%arg0: i32, %arg1: i32) -> (i32, i32, i32) {
    %c0_i32 = arith.constant 0 : i32
    %c0_i32_0 = arith.constant 0 : i32
    return %arg0, %arg1, %c0_i32 : i32, i32, i32
  }
}

module attributes {stable_mosaic.version = 11 : i64} {
  func.func @_qkv_kernel(%arg0: i32, %arg1: i32, %arg2: memref<1x8x32xf32, #tpu.memory_space<vmem>>, %arg3: memref<1x8x32xf32, #tpu.memory_space<vmem>>, %arg4: memref<32x64xbf16, #tpu.memory_space<vmem>>, %arg5: memref<1x64xf32, #tpu.memory_space<vmem>>, %arg6: memref<32x32xbf16, #tpu.memory_space<vmem>>, %arg7: memref<1x32xf32, #tpu.memory_space<vmem>>, %arg8: memref<1x32xf32, #tpu.memory_space<vmem>>, %arg9: memref<1x32xf32, #tpu.memory_space<vmem>>, %arg10: memref<1x8x32xbf16, #tpu.memory_space<vmem>>, %arg11: memref<1x8x32xbf16, #tpu.memory_space<vmem>>, %arg12: memref<1x8x32xbf16, #tpu.memory_space<vmem>>) attributes {dimension_semantics = [#tpu.dimension_semantics<parallel>, #tpu.dimension_semantics<parallel>], iteration_bounds = array<i64: 2, 2>, scalar_prefetch = 0 : i64, scratch_operands = 0 : i64, tpu.core_type = #tpu.core_type<tc>, window_params = [{transform_indices = @transform_0, window_bounds = array<i64: 1, 8, 32>}, {transform_indices = @transform_1, window_bounds = array<i64: 1, 8, 32>}, {pipeline_mode = #tpu.pipeline_mode<synchronous>, transform_indices = @transform_2, window_bounds = array<i64: 32, 64>}, {pipeline_mode = #tpu.pipeline_mode<synchronous>, transform_indices = @transform_3, window_bounds = array<i64: 1, 64>}, {pipeline_mode = #tpu.pipeline_mode<synchronous>, transform_indices = @transform_4, window_bounds = array<i64: 32, 32>}, {pipeline_mode = #tpu.pipeline_mode<synchronous>, transform_indices = @transform_5, window_bounds = array<i64: 1, 32>}, {pipeline_mode = #tpu.pipeline_mode<synchronous>, transform_indices = @transform_6, window_bounds = array<i64: 1, 32>}, {pipeline_mode = #tpu.pipeline_mode<synchronous>, transform_indices = @transform_7, window_bounds = array<i64: 1, 32>}, {transform_indices = @transform_8, window_bounds = array<i64: 1, 8, 32>}, {transform_indices = @transform_9, window_bounds = array<i64: 1, 8, 32>}, {transform_indices = @transform_10, window_bounds = array<i64: 1, 8, 32>}]} {
    %c0 = arith.constant 0 : index
    %c0_0 = arith.constant 0 : index
    %c0_1 = arith.constant 0 : index
    %0 = vector.load %arg2[%c0, %c0_0, %c0_1] : memref<1x8x32xf32, #tpu.memory_space<vmem>>, vector<1x8x32xf32>
    %1 = vector.shape_cast %0 : vector<1x8x32xf32> to vector<8x32xf32>
    %c0_2 = arith.constant 0 : index
    %c0_3 = arith.constant 0 : index
    %c0_4 = arith.constant 0 : index
    %2 = vector.load %arg3[%c0_2, %c0_3, %c0_4] : memref<1x8x32xf32, #tpu.memory_space<vmem>>, vector<1x8x32xf32>
    %3 = vector.shape_cast %2 : vector<1x8x32xf32> to vector<8x32xf32>
    %c0_5 = arith.constant 0 : index
    %c0_6 = arith.constant 0 : index
    %4 = vector.load %arg8[%c0_5, %c0_6] : memref<1x32xf32, #tpu.memory_space<vmem>>, vector<1x32xf32>
    %c0_7 = arith.constant 0 : index
    %c0_8 = arith.constant 0 : index
    %5 = vector.load %arg9[%c0_7, %c0_8] : memref<1x32xf32, #tpu.memory_space<vmem>>, vector<1x32xf32>
    %cst = arith.constant dense<0.000000e+00> : vector<8xf32>
    %6 = vector.multi_reduction <add>, %1, %cst [1] : vector<8x32xf32> to vector<8xf32>
    %7 = vector.shape_cast %6 : vector<8xf32> to vector<8x1xf32>
    %8 = arith.mulf %1, %1 : vector<8x32xf32>
    %cst_9 = arith.constant dense<0.000000e+00> : vector<8xf32>
    %9 = vector.multi_reduction <add>, %8, %cst_9 [1] : vector<8x32xf32> to vector<8xf32>
    %10 = vector.shape_cast %9 : vector<8xf32> to vector<8x1xf32>
    %cst_10 = arith.constant 3.125000e-02 : f32
    %11 = vector.broadcast %cst_10 : f32 to vector<8x1xf32>
    %12 = arith.mulf %7, %11 : vector<8x1xf32>
    %cst_11 = arith.constant 3.125000e-02 : f32
    %13 = vector.broadcast %cst_11 : f32 to vector<8x1xf32>
    %14 = arith.mulf %10, %13 : vector<8x1xf32>
    %15 = arith.mulf %12, %12 : vector<8x1xf32>
    %16 = arith.subf %14, %15 : vector<8x1xf32>
    %cst_12 = arith.constant 0.000000e+00 : f32
    %17 = vector.broadcast %cst_12 : f32 to vector<8x1xf32>
    %18 = arith.maximumf %16, %17 : vector<8x1xf32>
    %19 = vector.broadcast %12 : vector<8x1xf32> to vector<8x32xf32>
    %20 = arith.subf %1, %19 : vector<8x32xf32>
    %cst_13 = arith.constant 9.99999974E-6 : f32
    %21 = vector.broadcast %cst_13 : f32 to vector<8x1xf32>
    %22 = arith.addf %18, %21 : vector<8x1xf32>
    %23 = math.rsqrt %22 : vector<8x1xf32>
    %24 = vector.broadcast %23 : vector<8x1xf32> to vector<8x32xf32>
    %25 = arith.mulf %20, %24 : vector<8x32xf32>
    %26 = vector.broadcast %4 : vector<1x32xf32> to vector<8x32xf32>
    %27 = arith.mulf %25, %26 : vector<8x32xf32>
    %28 = vector.broadcast %5 : vector<1x32xf32> to vector<8x32xf32>
    %29 = arith.addf %27, %28 : vector<8x32xf32>
    %30 = arith.addf %29, %3 : vector<8x32xf32>
    %31 = arith.truncf %30 : vector<8x32xf32> to vector<8x32xbf16>
    %c0_14 = arith.constant 0 : index
    %c0_15 = arith.constant 0 : index
    %32 = vector.load %arg4[%c0_14, %c0_15] : memref<32x64xbf16, #tpu.memory_space<vmem>>, vector<32x64xbf16>
    %cst_16 = arith.constant dense<0.000000e+00> : vector<8x64xf32>
    %33 = tpu.matmul %31, %32, %cst_16 {dimension_numbers = #tpu.dot_dimension_numbers<[1], [0], [0], [1], [0, 0, 1, 1], [], []>} : vector<8x32xbf16>, vector<32x64xbf16>, vector<8x64xf32> -> vector<8x64xf32>
    %c0_17 = arith.constant 0 : index
    %c0_18 = arith.constant 0 : index
    %34 = vector.load %arg5[%c0_17, %c0_18] : memref<1x64xf32, #tpu.memory_space<vmem>>, vector<1x64xf32>
    %35 = vector.broadcast %34 : vector<1x64xf32> to vector<8x64xf32>
    %36 = arith.addf %33, %35 : vector<8x64xf32>
    %37 = vector.extract_strided_slice %36 {offsets = [0, 0], sizes = [8, 32], strides = [1, 1]} : vector<8x64xf32> to vector<8x32xf32>
    %cst_19 = arith.constant 0.353553385 : f32
    %38 = vector.broadcast %cst_19 : f32 to vector<8x32xf32>
    %39 = arith.mulf %37, %38 : vector<8x32xf32>
    %40 = arith.truncf %39 : vector<8x32xf32> to vector<8x32xbf16>
    %c0_20 = arith.constant 0 : index
    %c0_21 = arith.constant 0 : index
    %c0_22 = arith.constant 0 : index
    %41 = vector.load %arg10[%c0_20, %c0_21, %c0_22] : memref<1x8x32xbf16, #tpu.memory_space<vmem>>, vector<1x8x32xbf16>
    %42 = vector.shape_cast %41 : vector<1x8x32xbf16> to vector<8x32xbf16>
    %43 = vector.shape_cast %40 : vector<8x32xbf16> to vector<1x8x32xbf16>
    tpu.vector_store %arg10[%c0_20, %c0_21, %c0_22], %43 {strides = array<i32>} : memref<1x8x32xbf16, #tpu.memory_space<vmem>>, vector<1x8x32xbf16>,
    %44 = vector.extract_strided_slice %36 {offsets = [0, 32], sizes = [8, 32], strides = [1, 1]} : vector<8x64xf32> to vector<8x32xf32>
    %45 = arith.truncf %44 : vector<8x32xf32> to vector<8x32xbf16>
    %c0_23 = arith.constant 0 : index
    %c0_24 = arith.constant 0 : index
    %c0_25 = arith.constant 0 : index
    %46 = vector.load %arg11[%c0_23, %c0_24, %c0_25] : memref<1x8x32xbf16, #tpu.memory_space<vmem>>, vector<1x8x32xbf16>
    %47 = vector.shape_cast %46 : vector<1x8x32xbf16> to vector<8x32xbf16>
    %48 = vector.shape_cast %45 : vector<8x32xbf16> to vector<1x8x32xbf16>
    tpu.vector_store %arg11[%c0_23, %c0_24, %c0_25], %48 {strides = array<i32>} : memref<1x8x32xbf16, #tpu.memory_space<vmem>>, vector<1x8x32xbf16>,
    %49 = arith.truncf %29 : vector<8x32xf32> to vector<8x32xbf16>
    %c0_26 = arith.constant 0 : index
    %c0_27 = arith.constant 0 : index
    %50 = vector.load %arg6[%c0_26, %c0_27] : memref<32x32xbf16, #tpu.memory_space<vmem>>, vector<32x32xbf16>
    %cst_28 = arith.constant dense<0.000000e+00> : vector<8x32xf32>
    %51 = tpu.matmul %49, %50, %cst_28 {dimension_numbers = #tpu.dot_dimension_numbers<[1], [0], [0], [1], [0, 0, 1, 1], [], []>} : vector<8x32xbf16>, vector<32x32xbf16>, vector<8x32xf32> -> vector<8x32xf32>
    %c0_29 = arith.constant 0 : index
    %c0_30 = arith.constant 0 : index
    %52 = vector.load %arg7[%c0_29, %c0_30] : memref<1x32xf32, #tpu.memory_space<vmem>>, vector<1x32xf32>
    %53 = vector.broadcast %52 : vector<1x32xf32> to vector<8x32xf32>
    %54 = arith.addf %51, %53 : vector<8x32xf32>
    %55 = arith.truncf %54 : vector<8x32xf32> to vector<8x32xbf16>
    %c0_31 = arith.constant 0 : index
    %c0_32 = arith.constant 0 : index
    %c0_33 = arith.constant 0 : index
    %56 = vector.load %arg12[%c0_31, %c0_32, %c0_33] : memref<1x8x32xbf16, #tpu.memory_space<vmem>>, vector<1x8x32xbf16>
    %57 = vector.shape_cast %56 : vector<1x8x32xbf16> to vector<8x32xbf16>
    %58 = vector.shape_cast %55 : vector<8x32xbf16> to vector<1x8x32xbf16>
    tpu.vector_store %arg12[%c0_31, %c0_32, %c0_33], %58 {strides = array<i32>} : memref<1x8x32xbf16, #tpu.memory_space<vmem>>, vector<1x8x32xbf16>,
    return
  }
  func.func @transform_0(%arg0: i32, %arg1: i32) -> (i32, i32, i32) {
    %c0_i32 = arith.constant 0 : i32
    %c0_i32_0 = arith.constant 0 : i32
    return %arg0, %arg1, %c0_i32 : i32, i32, i32
  }
  func.func @transform_1(%arg0: i32, %arg1: i32) -> (i32, i32, i32) {
    %c0_i32 = arith.constant 0 : i32
    %c0_i32_0 = arith.constant 0 : i32
    return %arg0, %arg1, %c0_i32 : i32, i32, i32
  }
  func.func @transform_2(%arg0: i32, %arg1: i32) -> (i32, i32) {
    %c0_i32 = arith.constant 0 : i32
    %c0_i32_0 = arith.constant 0 : i32
    %c0_i32_1 = arith.constant 0 : i32
    return %c0_i32, %c0_i32_0 : i32, i32
  }
  func.func @transform_3(%arg0: i32, %arg1: i32) -> (i32, i32) {
    %c0_i32 = arith.constant 0 : i32
    %c0_i32_0 = arith.constant 0 : i32
    %c0_i32_1 = arith.constant 0 : i32
    return %c0_i32, %c0_i32_0 : i32, i32
  }
  func.func @transform_4(%arg0: i32, %arg1: i32) -> (i32, i32) {
    %c0_i32 = arith.constant 0 : i32
    %c0_i32_0 = arith.constant 0 : i32
    %c0_i32_1 = arith.constant 0 : i32
    return %c0_i32, %c0_i32_0 : i32, i32
  }
  func.func @transform_5(%arg0: i32, %arg1: i32) -> (i32, i32) {
    %c0_i32 = arith.constant 0 : i32
    %c0_i32_0 = arith.constant 0 : i32
    %c0_i32_1 = arith.constant 0 : i32
    return %c0_i32, %c0_i32_0 : i32, i32
  }
  func.func @transform_6(%arg0: i32, %arg1: i32) -> (i32, i32) {
    %c0_i32 = arith.constant 0 : i32
    %c0_i32_0 = arith.constant 0 : i32
    %c0_i32_1 = arith.constant 0 : i32
    return %c0_i32, %c0_i32_0 : i32, i32
  }
  func.func @transform_7(%arg0: i32, %arg1: i32) -> (i32, i32) {
    %c0_i32 = arith.constant 0 : i32
    %c0_i32_0 = arith.constant 0 : i32
    %c0_i32_1 = arith.constant 0 : i32
    return %c0_i32, %c0_i32_0 : i32, i32
  }
  func.func @transform_8(%arg0: i32, %arg1: i32) -> (i32, i32, i32) {
    %c0_i32 = arith.constant 0 : i32
    %c0_i32_0 = arith.constant 0 : i32
    return %arg0, %arg1, %c0_i32 : i32, i32, i32
  }
  func.func @transform_9(%arg0: i32, %arg1: i32) -> (i32, i32, i32) {
    %c0_i32 = arith.constant 0 : i32
    %c0_i32_0 = arith.constant 0 : i32
    return %arg0, %arg1, %c0_i32 : i32, i32, i32
  }
  func.func @transform_10(%arg0: i32, %arg1: i32) -> (i32, i32, i32) {
    %c0_i32 = arith.constant 0 : i32
    %c0_i32_0 = arith.constant 0 : i32
    return %arg0, %arg1, %c0_i32 : i32, i32, i32
  }
}

</mosaic_0001>

<bundles_post_ra>
// kernel: tpu_custom_call.1
= control target key start
LH: loop header
LB: loop body
LE: loop exit
PB: predicated region body
PF: predicated region fallthrough
CT: control target
= control target key end

     0   :  { %s1877_s0 = inlined_call_operand.hbm [shape: f32[2,16,32], index: 0, kind: input, shape index: {}]   ;;  %s1878_s1 = inlined_call_operand.hbm [shape: f32[2,16,32], index: 1, kind: input, shape index: {}]   ;;  %s1879_s2 = inlined_call_operand.hbm [shape: bf16[32,64], index: 2, kind: input, shape index: {}]   ;;  %s1880_s3 = inlined_call_operand.vmem [shape: f32[1,64], index: 3, kind: input, shape index: {}]   ;;  %s1881_s4 = inlined_call_operand.hbm [shape: bf16[32,32], index: 4, kind: input, shape index: {}]   ;;  %s1882_s5 = inlined_call_operand.vmem [shape: f32[1,32], index: 5, kind: input, shape index: {}]   ;;  %s1883_s6 = inlined_call_operand.vmem [shape: f32[1,32], index: 6, kind: input, shape index: {}]   ;;  %s1884_s7 = inlined_call_operand.vmem [shape: f32[1,32], index: 7, kind: input, shape index: {}]   ;;  %s1885_s8 = inlined_call_operand.hbm [shape: bf16[2,16,32], index: 8, kind: output, shape index: {0}]   ;;  %s1886_s9 = inlined_call_operand.hbm [shape: bf16[2,16,32], index: 9, kind: output, shape index: {1}]   ;;  %s1887_s10 = inlined_call_operand.hbm [shape: bf16[2,16,32], index: 10, kind: output, shape index: {2}]  }
   0x1   :  { %1902 = sst [smem:[#allocation25_spill]] %s1879_s2 }
   0x2   :  { %1903 = sst [smem:[#allocation26_spill]] %s1880_s3 }
   0x3   :  { %1904 = sst [smem:[#allocation27_spill]] %s1881_s4 }
   0x4   :  { %1905 = sst [smem:[#allocation28_spill]] %s1882_s5 }
   0x5   :  { %1906 = sst [smem:[#allocation29_spill]] %s1885_s8 }
   0x6   :  { %1907 = sst [smem:[#allocation30_spill]] %s1886_s9 }
   0x7   :  { %1908 = sst [smem:[#allocation31_spill]] %s1887_s10 }
   0x8   :  { %16 = vsyncpa [#allocation3], 0 }
   0x9   :  { %18 = vsyncpa [#allocation3 + $0x1], 0 }
   0xa   :  { %19 = vsyncpa [#allocation6], 0 }
   0xb   :  { %21 = vsyncpa [#allocation6 + $0x1], 0 }
   0xc   :  { %22 = vsyncpa [#allocation9], 0 }
   0xd   :  { %23 = vsyncpa [#allocation4], 0 }
   0xe   :  { %25 = vsyncpa [#allocation4 + $0x1], 0 }
   0xf   :  { %26 = vsyncpa [#allocation12], 0 }
  0x10   :  { %28 = vsyncpa [#allocation12 + $0x1], 0  ;;  %s1465_s13 = smov 0   ;;  %s1467_s14 = smov 0  }
  0x11   :  { %s1469_s15 = smov 0   ;;  %s1471_s16 = smov 0  }
  0x12   :  { %s1473_s17 = smov 0   ;;  %s1475_s18 = smov 0  }
  0x13   :  { %s1477_s19 = smov 0   ;;  %s1479_s20 = smov 0  }
  0x14 LB: > { %1909 = sst [smem:[#allocation20_spill]] %s1368_s13  ;;  %s1506_s21 = sadd.s32 4294967295, %s1396_s20   ;;  %s1396_s20 = sphi %s1479_s20, %s34_s20   ;;  %s1392_s19 = sphi %s1477_s19, %s1949_s19   ;;  %s1388_s18 = sphi %s1475_s18, %s1948_s18   ;;  %s1384_s17 = sphi %s1473_s17, %s1947_s17   ;;  %s1380_s16 = sphi %s1471_s16, %s1946_s16   ;;  %s1376_s15 = sphi %s1469_s15, %s1945_s15   ;;  %s1372_s14 = sphi %s1467_s14, %s1944_s14   ;;  %s1368_s13 = sphi %s1465_s13, %s1943_s13  }
  0x15   : > { %s1888_s22 = sadd.s32 4294967294, %s1396_s20   ;;  %p68_p0 = scmp.ne.s32.totalorder %s1372_s14, %s1368_s13 }
  0x16   : > { %p1892_p1 = scmp.eq.s32.totalorder %s1506_s21, 0  ;;  %p254_p3 = scmp.eq.s32.totalorder %s1888_s22, 3 }
  0x17   : > { %p922_p5 = scmp.ge.s32.totalorder %s1396_s20, 1  ;;  %p317_p7 = scmp.lt.s32.totalorder %s1396_s20, 5 }
  0x18   : > { %p1517_p4 = por %p1892_p1, %p68_p0  ;;  %p1522_p6 = por %p254_p3, %p68_p0 }
  0x19   : > { %p1527_p8 = pnand %p922_p5, %p317_p7  ;;  %s1398_s26 = smov [#allocation7]  }
  0x1a   : > { %s1910_s23 = scalar_select %p1517_p4, 1, 0 }
  0x1b   : > { %s1911_s24 = scalar_select %p1522_p6, 1, 0 }
  0x1c   : > { %s1913_s25 = scalar_select %p1527_p8, 1, 0 }
  0x1d   : > { %1912 = sst [smem:[#allocation21_spill]] %s1911_s24  ;;  %s329_s27 = sshll.u32 %s1398_s26, 4  ;;  %s330_s27 = int_to_ptr.vmem [resolvable:$true] %s329_s27 }
  0x1e   : > { %p1003_p9 = pneg %p1527_p8  ;;  %s1399_s29 = smov [#allocation8]  }
  0x1f   : > { %s345_s30 = sshll.u32 %s1399_s29, 4  ;;  %s1915_s2 = sld [smem:[#allocation25_spill]]  ;;  %s1539_s30 = int_to_ptr.vmem [resolvable:$true] %s345_s30 }
  0x20   : > { %p1535_p10 = pnand %p1003_p9, %p1892_p1 }
  0x22   : > { %p1112_p12 = pneg %p1535_p10 }
  0x25   : > { %s1110_s22 = scalar_lea.hbm %s1915_s2, 256 }
  0x26   : > { %p1111_p11 = scmp.ne.s32.totalorder %s1915_s2, %s1110_s22  ;;  %p1117_p3 = scmp.lt.u32.totalorder %s1110_s22, %s1915_s2 }
  0x28   : > { %p1113_p13 = pnand %p1112_p12, %p1111_p11 }
  0x2a   : > { %p1114_p0 = pneg %p1113_p13 }
  0x2c   : > { %p1119_p5 = pnand %p1117_p3, %p1114_p0 }
  0x2e   : > { %1122 = shalt.err (!%p1119_p5)
}
  0x2f   : > { %s1123_s29 = scalar_lea.vmem %s330_s27, 256  ;;  %p1131_p2 = scmp.lt.s32.totalorder %s330_s27, %s330_s27 }
  0x30   : > { %p1124_p7 = scmp.ne.s32.totalorder %s330_s27, %s1123_s29  ;;  %p1132_p6 = scmp.lt.s32.totalorder %s1123_s29, %s1123_s29 }
  0x32   : > { %p1126_p9 = pnand %p1124_p7, %p1112_p12  ;;  %p1133_p4 = por %p1132_p6, %p1131_p2 }
  0x34   : > { %p1127_p1 = pneg %p1126_p9 }
  0x36   : > { %p1134_p8 = pnand %p1133_p4, %p1127_p1 }
  0x38   : > { %1137 = shalt.err (!%p1134_p8)
}
  0x39   : > { %s1400_s24 = smov 64   ;;  %s1401_s11 = smov 4  }
  0x3a   : > { %1006 = dma.hbm_to_vmem [thread:$0]  (!%p1535_p10), %s1915_s2, 256, %s330_s27, [#allocation6], %s1400_s24, %s1400_s24, %s1401_s11  }
  0x3b   : > { %s1916_s4 = sld [smem:[#allocation27_spill]] }
  0x41   : > { %s1138_s26 = scalar_lea.hbm %s1916_s4, 256 }
  0x42   : > { %p1139_p11 = scmp.ne.s32.totalorder %s1916_s4, %s1138_s26  ;;  %p1145_p4 = scmp.lt.u32.totalorder %s1138_s26, %s1916_s4 }
  0x44   : > { %p1141_p1 = pnand %p1139_p11, %p1112_p12 }
  0x46   : > { %p1142_p2 = pneg %p1141_p1 }
  0x48   : > { %p1147_p6 = pnand %p1145_p4, %p1142_p2 }
  0x4a   : > { %1150 = shalt.err (!%p1147_p6)
}
  0x4b   : > { %s1151_s27 = scalar_lea.vmem %s1539_s30, 256  ;;  %p1159_p3 = scmp.lt.s32.totalorder %s1539_s30, %s1539_s30 }
  0x4c   : > { %p1152_p8 = scmp.ne.s32.totalorder %s1539_s30, %s1151_s27  ;;  %p1160_p5 = scmp.lt.s32.totalorder %s1151_s27, %s1151_s27 }
  0x4e   : > { %p1154_p13 = pnand %p1152_p8, %p1112_p12  ;;  %p1161_p7 = por %p1160_p5, %p1159_p3 }
  0x50   : > { %p1155_p0 = pneg %p1154_p13 }
  0x52   : > { %p1162_p9 = pnand %p1161_p7, %p1155_p0 }
  0x54   : > { %1165 = shalt.err (!%p1162_p9)
}
  0x55   : > { %1009 = dma.hbm_to_vmem [thread:$0]  (!%p1535_p10), %s1916_s4, 256, %s1539_s30, [#allocation9], %s1400_s24, %s1400_s24, %s1401_s11  }
  0x56   : > { %s43_s9 = sadd.s32 1, %s1388_s18  ;;  %s46_s10 = sadd.s32 1, %s1392_s19 }
  0x57   : > { %p44_p12 = scmp.ge.s32.totalorder %s43_s9, 2  ;;  %s55_s28 = sadd.s32 1, %s1376_s15 }
  0x58   : > { %p62_p11 = scmp.ne.s32.totalorder %s1376_s15, %s1372_s14  ;;  %p63_p1 = scmp.eq.s32.totalorder %s1396_s20, 0 }
  0x59   : > { %s1951_s9 = smov (%p44_p12, %s43_s9), 0  ;;  %s1953_s10 = smov (!%p44_p12, %s46_s10), %s1392_s19 }
  0x5a   : > { %1917 = sst [smem:[#allocation22_spill]] %s1951_s9  ;;  %s51_s13 = ssub.s32 %s1388_s18, %s1951_s9 }
  0x5b   : > { %p1599_p2 = por %p63_p1, %p62_p11  ;;  %p48_p10 = scmp.ge.s32.totalorder %s1953_s10, 2 }
  0x5c   : > { %p1919_p4 = scmp.eq.s32.totalorder %s1506_s21, 3  ;;  %p1029_p8 = scmp.lt.s32.totalorder %s1396_s20, 4 }
  0x5d   : > { %s368_s24 = sand.u32 1, %s1376_s15   ;;  %s1955_s10 = smov (%p48_p10, %s1953_s10), 0 }
  0x5e   : > { %p1605_p6 = por %p1919_p4, %p62_p11  ;;  %1922 = sst [smem:[#allocation24_spill]] %s1955_s10 }
  0x5f   : > { %s1613_s11 = sshll.u32 %s368_s24, 3  ;;  %s50_s12 = ssub.s32 %s1392_s19, %s1955_s10 }
  0x60   : > { %s1920_s30 = scalar_select %p1605_p6, 1, 0 }
  0x61   : > { %s52_s26 = sor.u32 %s51_s13, %s50_s12  ;;  %s927_s29 = sshll.u32 %s1392_s19, 1 }
  0x62   : > { %1921 = sst [smem:[#allocation23_spill]] %s1920_s30  ;;  %p53_p13 = scmp.eq.s32.totalorder %s52_s26, 0 }
  0x63   : > { %s377_s27 = sadd.s32 %s1388_s18, %s927_s29  ;;  %s372_s8 = scalar_lea.vmem [#allocation2], %s1613_s11 }
  0x64   : > { %s928_s3 = sshll.u32 %s377_s27, 7  ;;  %s381_s2 = sshll.u32 %s372_s8, 4  ;;  %s1628_s2 = int_to_ptr.vmem [resolvable:$true] %s381_s2 }
  0x65   : > { %s1621_s4 = scalar_select %p53_p13, %s1376_s15, %s55_s28  }
  0x66   : > { %s1626_s5 = scalar_lea.hbm %s1877_s0, %s928_s3  ;;  %p1634_p0 = pnand %p1029_p8, %p1599_p2 }
  0x67   : > { %s1641_s9 = scalar_lea.hbm %s1878_s1, %s928_s3  ;;  %s388_s30 = sand.u32 1, %s1396_s20  }
  0x68   : > { %s369_s26 = scalar_lea.sflag [#allocation3], %s368_s24  ;;  %s1166_s29 = scalar_lea.hbm %s1626_s5, 128 }
  0x69   : > { %p1167_p3 = scmp.ne.s32.totalorder %s1626_s5, %s1166_s29  ;;  %p1168_p5 = pneg %p1634_p0 }
  0x6a   : > { %s1171_s8 = scalar_lea.hbm %s1877_s0, 512  ;;  %p1172_p12 = scmp.lt.u32.totalorder %s1626_s5, %s1877_s0 }
  0x6b   : > { %p1169_p7 = pnand %p1168_p5, %p1167_p3  ;;  %p1173_p11 = scmp.lt.u32.totalorder %s1171_s8, %s1166_s29 }
  0x6c   : > { %p1175_p2 = scmp.lt.u32.totalorder %s1166_s29, %s1626_s5 }
  0x6d   : > { %p1170_p9 = pneg %p1169_p7  ;;  %p1174_p1 = por %p1173_p11, %p1172_p12 }
  0x6f   : > { %p1176_p10 = por %p1175_p2, %p1174_p1 }
  0x71   : > { %p1177_p4 = pnand %p1176_p10, %p1170_p9 }
  0x73   : > { %1180 = shalt.err (!%p1177_p4)
}
  0x74   : > { %s1181_s24 = scalar_lea.vmem %s1628_s2, 128  ;;  %s1402_s3 = smov [#allocation2]  }
  0x75   : > { %p1182_p8 = scmp.ne.s32.totalorder %s1628_s2, %s1181_s24  ;;  %s1186_s28 = sshll.u32 %s1402_s3, 4  ;;  %s1187_s28 = int_to_ptr.vmem [resolvable:$false] %s1186_s28 }
  0x76   : > { %s1188_s10 = scalar_lea.vmem %s1187_s28, 256  ;;  %p1189_p7 = scmp.lt.s32.totalorder %s1628_s2, %s1187_s28 }
  0x77   : > { %p1184_p13 = pnand %p1182_p8, %p1168_p5  ;;  %p1190_p12 = scmp.lt.s32.totalorder %s1188_s10, %s1181_s24 }
  0x79   : > { %p1185_p3 = pneg %p1184_p13  ;;  %p1191_p11 = por %p1190_p12, %p1189_p7 }
  0x7b   : > { %p1192_p1 = pnand %p1191_p11, %p1185_p3 }
  0x7d   : > { %1195 = shalt.err (!%p1192_p1)
}
  0x7e   : > { %1013 = dma.hbm_to_vmem [thread:$0]  (!%p1634_p0), %s1626_s5, 128, %s1628_s2, %s369_s26  }
  0x7f   : > { %s392_s29 = scalar_lea.vmem [#allocation5], %s1613_s11  ;;  %s389_s27 = scalar_lea.sflag [#allocation6], %s388_s30 }
  0x80   : > { %s401_s22 = sshll.u32 %s392_s29, 4  ;;  %s1196_s8 = scalar_lea.hbm %s1641_s9, 128  ;;  %s402_s22 = int_to_ptr.vmem [resolvable:$true] %s401_s22 }
  0x81   : > { %p1197_p9 = scmp.ne.s32.totalorder %s1641_s9, %s1196_s8  ;;  %s1201_s3 = scalar_lea.hbm %s1878_s1, 512 }
  0x82   : > { %p1202_p4 = scmp.lt.u32.totalorder %s1641_s9, %s1878_s1  ;;  %p1203_p8 = scmp.lt.u32.totalorder %s1201_s3, %s1196_s8 }
  0x83   : > { %p1199_p2 = pnand %p1197_p9, %p1168_p5  ;;  %p1205_p3 = scmp.lt.u32.totalorder %s1196_s8, %s1641_s9 }
  0x84   : > { %p1204_p13 = por %p1203_p8, %p1202_p4 }
  0x85   : > { %p1200_p10 = pneg %p1199_p2 }
  0x86   : > { %p1206_p7 = por %p1205_p3, %p1204_p13 }
  0x88   : > { %p1207_p12 = pnand %p1206_p7, %p1200_p10 }
  0x8a   : > { %1210 = shalt.err (!%p1207_p12)
}
  0x8b   : > { %s1211_s2 = scalar_lea.vmem %s402_s22, 128  ;;  %s1403_s5 = smov [#allocation5]  }
  0x8c   : > { %p1212_p11 = scmp.ne.s32.totalorder %s402_s22, %s1211_s2  ;;  %s1216_s11 = sshll.u32 %s1403_s5, 4  ;;  %s1217_s11 = int_to_ptr.vmem [resolvable:$false] %s1216_s11 }
  0x8d   : > { %s1218_s30 = scalar_lea.vmem %s1217_s11, 256  ;;  %p1219_p2 = scmp.lt.s32.totalorder %s402_s22, %s1217_s11 }
  0x8e   : > { %p1214_p1 = pnand %p1212_p11, %p1168_p5  ;;  %p1220_p6 = scmp.lt.s32.totalorder %s1218_s30, %s1211_s2 }
  0x90   : > { %p1215_p9 = pneg %p1214_p1  ;;  %p1221_p4 = por %p1220_p6, %p1219_p2 }
  0x92   : > { %p1222_p8 = pnand %p1221_p4, %p1215_p9 }
  0x94   : > { %1225 = shalt.err (!%p1222_p8)
}
  0x95   : > { %1016 = dma.hbm_to_vmem [thread:$0]  (!%p1634_p0), %s1641_s9, 128, %s402_s22, %s389_s27  }
  0x96   : > { %p1924_p10 = scmp.ne.s32.totalorder %s1913_s25, 0 }
  0x97   : > { %s1694_s26 = sand.u32 (!%p1924_p10), 1, %s1372_s14   ;;  %p1925_p5 = scmp.ne.s32.totalorder (!%p1924_p10), %s1910_s23, 0 }
  0x98   : > { %410 = sbr.rel (%p1924_p10) target bundleno = 714 (0x2ca), region = 52  ;;  %s933_s29 = sshll.u32 (!%p1924_p10), %s1694_s26, 3 }
  0x99   : > { %s413_s8 = scalar_lea.sflag (!%p1924_p10), [#allocation3], %s1694_s26  ;;  %s416_s12 = scalar_lea.vmem (!%p1924_p10), [#allocation2], %s933_s29 }
  0x9f   : > { %1343 = dma.done.wait (%p1925_p5), %s413_s8, 128  }
  0xa0   : > { %1345 = vsyncadd (%p1925_p5), %s413_s8, 4294967168  ;;  %s421_s13 = sand.u32 1, %s1506_s21   ;;  %s1705_s9 = scalar_lea.vmem [#allocation5], %s933_s29 }
  0xa1   : > { %s422_s25 = scalar_lea.sflag [#allocation6], %s421_s13 }
  0xa2   : > { %1347 = dma.done.wait (%p1925_p5), %s422_s25, 128  }
  0xa3   : > { %1349 = vsyncadd (%p1925_p5), %s422_s25, 4294967168  ;;  %p1926_p6 = scmp.eq.s32.totalorder %s1506_s21, 0 }
  0xa5   : > { %1351 = dma.done.wait (%p1926_p6), [#allocation6], 256   ;;  %p1927_p0 = pmov %p1926_p6 }
  0xa7   : > { %1353 = vsyncadd (%p1927_p0), [#allocation6], 4294967040  ;;  %p1928_p13 = pmov %p1927_p0 }
  0xa8   : > { %p1929_p3 = pmov %p1927_p0 }
  0xa9   : > { %1355 = dma.done.wait (%p1928_p13), [#allocation9], 256  }
  0xaa   : > { %1357 = vsyncadd (%p1929_p3), [#allocation9], 4294967040  ;;  %vm490_vm0 = vcmask 261120   ;;  %v486_v0 = vld [vmem:[%s416_s12] sm:$0xff]  ;;  %v1104_v4 = vld [vmem:[#allocation8] sm:$0xff]   ;;  %v1404_v6 = vmov 0.0  }
  0xab   : > { %v491_v1 = vsel %vm490_vm0, %v486_v0, 0.0  ;;  %v494_v2 = vmul.f32 %v486_v0, %v486_v0  ;;  %v1105_v5 = vld [vmem:[#allocation7] sm:$0xff]   ;;  %977 = vmatprep.subr.bf16.mxu1 %v1404_v6  ;;  %969 = vmatprep.subr.bf16.mxu0 %v1404_v6  ;;  %v1106_v7 = vld [vmem:[#allocation8 + $0x8] sm:$0xff]   ;;  %v1107_v8 = vld [vmem:[#allocation7 + $0x8] sm:$0xff]   ;;  %vm1405_vm1 = vmmov 0   ;;  %s1930_s10 = sld [smem:[#allocation28_spill]] }
  0xac   : > { %492 = vadd.xlane.f32.xlu0 %v491_v1  ;;  %978 = vmatpush3.bf16.msra.mxu1 %v1104_v4  ;;  %v940_v19 = vld [vmem:[%s1883_s6] ss:$0 sm:$0xff]  ;;  %v487_v23 = vld [vmem:[%s1705_s9] sm:$0xff]  ;;  %s954_s2 = sshll.u32 %s1384_s17, 1  ;;  %s1735_s5 = sshll.u32 %s1694_s26, 2  ;;  %vm591_vm2 = vcmask 257024  }
  0xad   : > { %v495_v3 = vsel %vm490_vm0, %v494_v2, 0.0  ;;  %970 = vmatpush3.bf16.msra.mxu0 %v1105_v5  ;;  %979 = vmatprep.subr.bf16.mxu1 %v1404_v6  ;;  %v941_v21 = vld [vmem:[%s1884_s7] ss:$0 sm:$0xff]  ;;  %s1931_s29 = sld [smem:[#allocation26_spill]]  ;;  %s692_s8 = sadd.s32 %s1380_s16, %s954_s2 }
  0xae   : > { %971 = vmatprep.subr.bf16.mxu0 %v1404_v6  ;;  %981 = vmatprep.mubr.msk.bf16.mxu1 %vm1405_vm1, %v1404_v6  ;;  %s1741_s17 = sshll.u32 %s692_s8, 6  ;;  %s470_s12 = scalar_lea.vmem [#allocation10], %s1735_s5 }
  0xaf   : > { %973 = vmatprep.mubr.msk.bf16.mxu0 %vm1405_vm1, %v1404_v6  ;;  %s1932_s25 = sld [smem:[#allocation23_spill]]  ;;  %s696_s9 = sshll.u32 %s470_s12, 4  ;;  %s1754_s9 = int_to_ptr.vmem [resolvable:$true] %s696_s9 }
  0xb0   : > { %496 = vadd.xlane.f32.xlu0 %v495_v3  ;;  %980 = vmatpush3.bf16.msra.mxu1 %v1106_v7  ;;  %s484_s16 = scalar_lea.vmem [#allocation13], %s1735_s5  ;;  %s1406_s23 = smov 96  }
  0xb1   : > { %972 = vmatpush3.bf16.msra.mxu0 %v1107_v8  ;;  %v947_v28 = vld [vmem:[%s1930_s10] ss:$0 sm:$0xff]  ;;  %s1933_s24 = sld [smem:[#allocation29_spill]]  ;;  %s671_s28 = scalar_lea.sflag [#allocation4], %s1694_s26 }
  0xb2   : > { %s1226_s10 = scalar_lea.vmem %s1754_s9, 64  ;;  %s1407_s2 = smov [#allocation10]  }
  0xb3   : > { %v942_v30 = vld [vmem:[%s1931_s29] ss:$0 sm:$0xff]  ;;  %p1227_p7 = scmp.ne.s32.totalorder %s1754_s9, %s1226_s10  ;;  %s1230_s11 = sshll.u32 %s1407_s2, 4  ;;  %s1231_s11 = int_to_ptr.vmem [resolvable:$false] %s1230_s11 }
  0xb4   : > { %s1232_s30 = scalar_lea.vmem %s1231_s11, 128  ;;  %p1233_p9 = scmp.lt.s32.totalorder %s1754_s9, %s1231_s11 }
  0xb5   : > { %p1934_p12 = scmp.ne.s32.totalorder %s1932_s25, 0  ;;  %p1234_p2 = scmp.lt.s32.totalorder %s1232_s30, %s1226_s10 }
  0xb7   : > { %s1752_s3 = scalar_lea.hbm %s1933_s24, %s1741_s17  ;;  %p1228_p11 = pnand %p1227_p7, %p1934_p12 }
  0xb8   : > { %p1235_p4 = por %p1234_p2, %p1233_p9 }
  0xb9   : > { %p1229_p1 = pneg %p1228_p11 }
  0xbb   : > { %p1236_p8 = pnand %p1235_p4, %p1229_p1 }
 0x139   : > { %v493_v9 = vpop.xlane.xlu0 %492 }
 0x13a   : > { %v498_v10 = vmul.f32 0.03125, %v493_v9 }
 0x13c   : > { %v500_v12 = vmul.f32 %v498_v10, %v498_v10  ;;  %v503_v17 = vsub.f32 %v486_v0, %v498_v10 }
 0x13d   : > { %v497_v11 = vpop.xlane.xlu0 %496 }
 0x13e   : > { %v499_v13 = vmul.f32 0.03125, %v497_v11 }
 0x140   : > { %v501_v14 = vsub.f32 %v499_v13, %v500_v12 }
 0x142   : > { %v502_v15 = vmax.f32 %v501_v14, 0.0 }
 0x144   : > { %v504_v16 = vadd.f32 1e-05, %v502_v15 }
 0x146   : > { %1108 = vrsqrt.f32 %v504_v16 }
 0x150   : > { %v1109_v18 = vpop.eup %1108 }
 0x151   : > { %v506_v20 = vmul.f32 %v1109_v18, %v503_v17 }
 0x153   : > { %v513_v22 = vmul.f32 %v940_v19, %v506_v20 }
 0x155   : > { %v520_v24 = vadd.f32 %v941_v21, %v513_v22 }
 0x157   : > { %v601_v25 = vpack.c.bf16 %v520_v24, %v520_v24  ;;  %v521_v26 = vadd.f32 %v520_v24, %v487_v23 }
 0x159   : > { %982 = vmatmul.mubr.msk.bf16.vlgmr.msra.gmra.mrb[0].mxu1 %vm490_vm0, %v601_v25  ;;  %v522_v27 = vpack.c.bf16 %v521_v26, %v521_v26 }
 0x15b   : > { %974 = vmatmul.mubr.msk.bf16.vlgmr.msra.gmra.mrb[0].mxu0 %vm490_vm0, %v522_v27 }
 0x22c   : > { %v662_v29 = vpop.f32.mrb[0].mxu1 }
 0x22d   : > { %v663_v31 = vadd.f32 %v947_v28, %v662_v29  ;;  %v983_v32 = vpop.f32.mrb[1].mxu1 }
 0x22e   : > { %v583_v33 = vpop.f32.mrb[0].mxu0  ;;  %v665_v34 = vpop.f32.mrb[2].mxu1 }
 0x22f   : > { %v668_v35 = vpack.c.bf16 %v663_v31, %v663_v31  ;;  %v584_v36 = vadd.f32 %v942_v30, %v583_v33  ;;  %v975_v37 = vpop.f32.mrb[1].mxu0  ;;  %v984_v38 = vpop.f32.mrb[3].mxu1 }
 0x230   : > { %v586_v39 = vpop.f32.mrb[2].mxu0 }
 0x231   : > { %v589_v40 = vmul.f32 0.35355338, %v584_v36  ;;  %v976_v41 = vpop.f32.mrb[3].mxu0  ;;  %v962_v42 = vpack.c.bf16 %v584_v36, %v584_v36  ;;  %669 = vst.msk [vmem:[%s484_s16] sm:$0xf] %vm591_vm2, %v668_v35 }
 0x233   : > { %v590_v43 = vpack.c.bf16 %v589_v40, %v589_v40  ;;  %597 = vrot.lane.b32.xlu1 %v962_v42, %s1406_s23 }
 0x235   : > { %592 = vst.msk [vmem:[%s470_s12] sm:$0xf] %vm591_vm2, %v590_v43 }
 0x236   : > { %1239 = shalt.err (!%p1236_p8)
}
 0x237   : > { %s1240_s26 = scalar_lea.hbm %s1752_s3, 64  ;;  %s1244_s12 = scalar_lea.hbm %s1933_s24, 256 }
 0x238   : > { %p1241_p10 = scmp.ne.s32.totalorder %s1752_s3, %s1240_s26  ;;  %p1245_p0 = scmp.lt.u32.totalorder %s1752_s3, %s1933_s24 }
 0x239   : > { %p1246_p13 = scmp.lt.u32.totalorder %s1244_s12, %s1240_s26  ;;  %p1248_p7 = scmp.lt.u32.totalorder %s1240_s26, %s1752_s3 }
 0x23a   : > { %p1242_p5 = pnand %p1241_p10, %p1934_p12 }
 0x23b   : > { %p1247_p3 = por %p1246_p13, %p1245_p0 }
 0x23c   : > { %p1243_p6 = pneg %p1242_p5 }
 0x23d   : > { %p1249_p11 = por %p1248_p7, %p1247_p3 }
 0x23f   : > { %p1250_p1 = pnand %p1249_p11, %p1243_p6 }
 0x241   : > { %1253 = shalt.err (!%p1250_p1)
}
 0x242   : > { %997 = dma.vmem_to_hbm [thread:$0]  (%p1934_p12), %s1754_s9, 64, %s1752_s3, %s671_s28  }
 0x243   : > { %s477_s27 = scalar_lea.vmem [#allocation11], %s1735_s5  ;;  %s726_s2 = sshll.u32 %s484_s16, 4  ;;  %s1796_s2 = int_to_ptr.vmem [resolvable:$true] %s726_s2 }
 0x244   : > { %s711_s10 = sshll.u32 %s477_s27, 4  ;;  %s1935_s26 = sld [smem:[#allocation30_spill]]  ;;  %s1788_s10 = int_to_ptr.vmem [resolvable:$true] %s711_s10 }
 0x245   : > { %s1936_s23 = sld [smem:[#allocation31_spill]]  ;;  %s1801_s5 = scalar_lea.sflag [#allocation12], %s421_s13 }
 0x246   : > { %s1254_s9 = scalar_lea.vmem %s1788_s10, 64  ;;  %s1408_s16 = smov [#allocation11]  }
 0x247   : > { %p1255_p9 = scmp.ne.s32.totalorder %s1788_s10, %s1254_s9  ;;  %s1258_s3 = sshll.u32 %s1408_s16, 4  ;;  %s1259_s3 = int_to_ptr.vmem [resolvable:$false] %s1258_s3 }
 0x248   : > { %s1260_s28 = scalar_lea.vmem %s1259_s3, 128  ;;  %p1261_p8 = scmp.lt.s32.totalorder %s1788_s10, %s1259_s3 }
 0x249   : > { %p1256_p2 = pnand %p1255_p9, %p1934_p12  ;;  %p1262_p10 = scmp.lt.s32.totalorder %s1260_s28, %s1254_s9 }
 0x24a   : > { %s1786_s29 = scalar_lea.hbm %s1935_s26, %s1741_s17 }
 0x24b   : > { %s1794_s22 = scalar_lea.hbm %s1936_s23, %s1741_s17  ;;  %p1257_p4 = pneg %p1256_p2 }
 0x24c   : > { %p1263_p5 = por %p1262_p10, %p1261_p8 }
 0x24e   : > { %p1264_p6 = pnand %p1263_p5, %p1257_p4 }
 0x2a5   : > { %v598_v44 = vpop.permute.xlu1 %597 }
 0x2a6   : > { %600 = vst.msk [vmem:[%s477_s27] sm:$0xf] %vm591_vm2, %v598_v44 }
 0x2a7   : > { %1267 = shalt.err (!%p1264_p6)
}
 0x2a8   : > { %s1268_s21 = scalar_lea.hbm %s1786_s29, 64  ;;  %s1272_s27 = scalar_lea.hbm %s1935_s26, 256 }
 0x2a9   : > { %p1269_p0 = scmp.ne.s32.totalorder %s1786_s29, %s1268_s21  ;;  %p1273_p7 = scmp.lt.u32.totalorder %s1786_s29, %s1935_s26 }
 0x2aa   : > { %p1274_p11 = scmp.lt.u32.totalorder %s1272_s27, %s1268_s21  ;;  %p1276_p9 = scmp.lt.u32.totalorder %s1268_s21, %s1786_s29 }
 0x2ab   : > { %p1270_p13 = pnand %p1269_p0, %p1934_p12 }
 0x2ac   : > { %p1275_p1 = por %p1274_p11, %p1273_p7 }
 0x2ad   : > { %p1271_p3 = pneg %p1270_p13 }
 0x2ae   : > { %p1277_p2 = por %p1276_p9, %p1275_p1 }
 0x2b0   : > { %p1278_p4 = pnand %p1277_p2, %p1271_p3 }
 0x2b2   : > { %1281 = shalt.err (!%p1278_p4)
}
 0x2b3   : > { %998 = dma.vmem_to_hbm [thread:$0]  (%p1934_p12), %s1788_s10, 64, %s1786_s29, %s1801_s5  }
 0x2b4   : > { %s1282_s8 = scalar_lea.vmem %s1796_s2, 64  ;;  %s1409_s12 = smov [#allocation13]  }
 0x2b5   : > { %p1283_p8 = scmp.ne.s32.totalorder %s1796_s2, %s1282_s8  ;;  %s1286_s9 = sshll.u32 %s1409_s12, 4  ;;  %s1287_s9 = int_to_ptr.vmem [resolvable:$false] %s1286_s9 }
 0x2b6   : > { %s1288_s16 = scalar_lea.vmem %s1287_s9, 128  ;;  %p1289_p6 = scmp.lt.s32.totalorder %s1796_s2, %s1287_s9 }
 0x2b7   : > { %p1284_p10 = pnand %p1283_p8, %p1934_p12  ;;  %p1290_p0 = scmp.lt.s32.totalorder %s1288_s16, %s1282_s8 }
 0x2b9   : > { %p1285_p5 = pneg %p1284_p10  ;;  %p1291_p13 = por %p1290_p0, %p1289_p6 }
 0x2bb   : > { %p1292_p3 = pnand %p1291_p13, %p1285_p5 }
 0x2bd   : > { %1295 = shalt.err (!%p1292_p3)
}
 0x2be   : > { %s1296_s10 = scalar_lea.hbm %s1794_s22, 64  ;;  %s1300_s28 = scalar_lea.hbm %s1936_s23, 256 }
 0x2bf   : > { %p1297_p7 = scmp.ne.s32.totalorder %s1794_s22, %s1296_s10  ;;  %p1301_p9 = scmp.lt.u32.totalorder %s1794_s22, %s1936_s23 }
 0x2c0   : > { %p1302_p2 = scmp.lt.u32.totalorder %s1300_s28, %s1296_s10  ;;  %p1304_p8 = scmp.lt.u32.totalorder %s1296_s10, %s1794_s22 }
 0x2c1   : > { %p1298_p11 = pnand %p1297_p7, %p1934_p12 }
 0x2c2   : > { %p1303_p4 = por %p1302_p2, %p1301_p9 }
 0x2c3   : > { %p1299_p1 = pneg %p1298_p11 }
 0x2c4   : > { %p1305_p10 = por %p1304_p8, %p1303_p4 }
 0x2c6   : > { %p1306_p5 = pnand %p1305_p10, %p1299_p1 }
 0x2c8   : > { %1309 = shalt.err (!%p1306_p5)
}
 0x2c9   : > { %999 = dma.vmem_to_hbm [thread:$0]  (%p1934_p12), %s1796_s2, 64, %s1794_s22, %s1801_s5  }
 0x2ca PF: > { %s1937_s17 = sld [smem:[#allocation20_spill]]  ;;  %s1938_s27 = sld [smem:[#allocation21_spill]] }
 0x2cb   : > { %p1032_p6 = scmp.ge.s32.totalorder %s1396_s20, 2 }
 0x2d0   : > { %s738_s11 = sand.u32 1, %s1937_s17   ;;  %p1939_p0 = scmp.ne.s32.totalorder %s1938_s27, 0 }
 0x2d1   : > { %s739_s30 = scalar_lea.sflag [#allocation4], %s738_s11 }
 0x2d2   : > { %p1018_p13 = pnand %p1032_p6, %p1939_p0 }
 0x2d4   : > { %1359 = dma.done.wait (!%p1018_p13), %s739_s30, 64  }
 0x2d5   : > { %1361 = vsyncadd (!%p1018_p13), %s739_s30, 4294967232  ;;  %s1940_s8 = sadd.s32 4294967294, %s1396_s20  }
 0x2d6   : > { %s747_s12 = sand.u32 1, %s1940_s8  }
 0x2d7   : > { %s748_s9 = scalar_lea.sflag [#allocation12], %s747_s12 }
 0x2d8   : > { %1363 = dma.done.wait (!%p1018_p13), %s748_s9, 128  }
 0x2d9   : > { %1365 = vsyncadd (!%p1018_p13), %s748_s9, 4294967168  ;;  %s34_s20 = sadd.s32 1, %s1396_s20   ;;  %s1941_s25 = sld [smem:[#allocation22_spill]] }
 0x2da   : > { %p31_p12 = scmp.ge.s32.totalorder %s34_s20, 6   ;;  %s1942_s2 = sld [smem:[#allocation24_spill]] }
 0x2db   : > { %s1943_s13 = smov %s1372_s14  ;;  %s1944_s14 = smov %s1376_s15 }
 0x2dc   : > { %s1945_s15 = smov %s1621_s4  ;;  %s1946_s16 = smov %s1388_s18 }
 0x2dd   : > { %s1947_s17 = smov %s1392_s19  ;;  %33 = sbr.rel (!%p31_p12) target bundleno = 20 (0x14), region = 150 }
 0x2df   : > { %s1948_s18 = smov %s1941_s25 }
 0x2e0   : > { %s1949_s19 = smov %s1942_s2 }
 0x2e4   :  { %762 = vsyncpa [#allocation3], 1 }
 0x2e5   :  { %764 = vsyncpa [#allocation3 + $0x1], 1 }
 0x2e6   :  { %765 = vsyncpa [#allocation6], 1 }
 0x2e7   :  { %767 = vsyncpa [#allocation6 + $0x1], 1 }
 0x2e8   :  { %768 = vsyncpa [#allocation9], 1 }
 0x2e9   :  { %769 = vsyncpa [#allocation4], 1 }
 0x2ea   :  { %771 = vsyncpa [#allocation4 + $0x1], 1 }
 0x2eb   :  { %772 = vsyncpa [#allocation12], 1 }
 0x2ec   :  { %774 = vsyncpa [#allocation12 + $0x1], 1 }

// kernel: tpu_custom_call.1
= control target key start
LH: loop header
LB: loop body
LE: loop exit
PB: predicated region body
PF: predicated region fallthrough
CT: control target
= control target key end

     0   :  { %s1877_s0 = inlined_call_operand.hbm [shape: f32[2,16,32], index: 0, kind: input, shape index: {}]   ;;  %s1878_s1 = inlined_call_operand.hbm [shape: f32[2,16,32], index: 1, kind: input, shape index: {}]   ;;  %s1879_s2 = inlined_call_operand.hbm [shape: bf16[32,64], index: 2, kind: input, shape index: {}]   ;;  %s1880_s3 = inlined_call_operand.vmem [shape: f32[1,64], index: 3, kind: input, shape index: {}]   ;;  %s1881_s4 = inlined_call_operand.hbm [shape: bf16[32,32], index: 4, kind: input, shape index: {}]   ;;  %s1882_s5 = inlined_call_operand.vmem [shape: f32[1,32], index: 5, kind: input, shape index: {}]   ;;  %s1883_s6 = inlined_call_operand.vmem [shape: f32[1,32], index: 6, kind: input, shape index: {}]   ;;  %s1884_s7 = inlined_call_operand.vmem [shape: f32[1,32], index: 7, kind: input, shape index: {}]   ;;  %s1885_s8 = inlined_call_operand.hbm [shape: bf16[2,16,32], index: 8, kind: output, shape index: {0}]   ;;  %s1886_s9 = inlined_call_operand.hbm [shape: bf16[2,16,32], index: 9, kind: output, shape index: {1}]   ;;  %s1887_s10 = inlined_call_operand.hbm [shape: bf16[2,16,32], index: 10, kind: output, shape index: {2}]  }
   0x1   :  { %1902 = sst [smem:[#allocation25_spill]] %s1879_s2 }
   0x2   :  { %1903 = sst [smem:[#allocation26_spill]] %s1880_s3 }
   0x3   :  { %1904 = sst [smem:[#allocation27_spill]] %s1881_s4 }
   0x4   :  { %1905 = sst [smem:[#allocation28_spill]] %s1882_s5 }
   0x5   :  { %1906 = sst [smem:[#allocation29_spill]] %s1885_s8 }
   0x6   :  { %1907 = sst [smem:[#allocation30_spill]] %s1886_s9 }
   0x7   :  { %1908 = sst [smem:[#allocation31_spill]] %s1887_s10 }
   0x8   :  { %16 = vsyncpa [#allocation3], 0 }
   0x9   :  { %18 = vsyncpa [#allocation3 + $0x1], 0 }
   0xa   :  { %19 = vsyncpa [#allocation6], 0 }
   0xb   :  { %21 = vsyncpa [#allocation6 + $0x1], 0 }
   0xc   :  { %22 = vsyncpa [#allocation9], 0 }
   0xd   :  { %23 = vsyncpa [#allocation4], 0 }
   0xe   :  { %25 = vsyncpa [#allocation4 + $0x1], 0 }
   0xf   :  { %26 = vsyncpa [#allocation12], 0 }
  0x10   :  { %28 = vsyncpa [#allocation12 + $0x1], 0  ;;  %s1465_s13 = smov 0   ;;  %s1467_s14 = smov 0  }
  0x11   :  { %s1469_s15 = smov 0   ;;  %s1471_s16 = smov 0  }
  0x12   :  { %s1473_s17 = smov 0   ;;  %s1475_s18 = smov 0  }
  0x13   :  { %s1477_s19 = smov 0   ;;  %s1479_s20 = smov 0  }
  0x14 LB: > { %1909 = sst [smem:[#allocation20_spill]] %s1368_s13  ;;  %s1506_s21 = sadd.s32 4294967295, %s1396_s20   ;;  %s1396_s20 = sphi %s1479_s20, %s34_s20   ;;  %s1392_s19 = sphi %s1477_s19, %s1949_s19   ;;  %s1388_s18 = sphi %s1475_s18, %s1948_s18   ;;  %s1384_s17 = sphi %s1473_s17, %s1947_s17   ;;  %s1380_s16 = sphi %s1471_s16, %s1946_s16   ;;  %s1376_s15 = sphi %s1469_s15, %s1945_s15   ;;  %s1372_s14 = sphi %s1467_s14, %s1944_s14   ;;  %s1368_s13 = sphi %s1465_s13, %s1943_s13  }
  0x15   : > { %s1888_s22 = sadd.s32 4294967294, %s1396_s20   ;;  %p68_p0 = scmp.ne.s32.totalorder %s1372_s14, %s1368_s13 }
  0x16   : > { %p1892_p1 = scmp.eq.s32.totalorder %s1506_s21, 0  ;;  %p254_p3 = scmp.eq.s32.totalorder %s1888_s22, 3 }
  0x17   : > { %p922_p5 = scmp.ge.s32.totalorder %s1396_s20, 1  ;;  %p317_p7 = scmp.lt.s32.totalorder %s1396_s20, 5 }
  0x18   : > { %p1517_p4 = por %p1892_p1, %p68_p0  ;;  %p1522_p6 = por %p254_p3, %p68_p0 }
  0x19   : > { %p1527_p8 = pnand %p922_p5, %p317_p7  ;;  %s1398_s26 = smov [#allocation7]  }
  0x1a   : > { %s1910_s23 = scalar_select %p1517_p4, 1, 0 }
  0x1b   : > { %s1911_s24 = scalar_select %p1522_p6, 1, 0 }
  0x1c   : > { %s1913_s25 = scalar_select %p1527_p8, 1, 0 }
  0x1d   : > { %1912 = sst [smem:[#allocation21_spill]] %s1911_s24  ;;  %s329_s27 = sshll.u32 %s1398_s26, 4  ;;  %s330_s27 = int_to_ptr.vmem [resolvable:$true] %s329_s27 }
  0x1e   : > { %p1003_p9 = pneg %p1527_p8  ;;  %s1399_s29 = smov [#allocation8]  }
  0x1f   : > { %s345_s30 = sshll.u32 %s1399_s29, 4  ;;  %s1915_s2 = sld [smem:[#allocation25_spill]]  ;;  %s1539_s30 = int_to_ptr.vmem [resolvable:$true] %s345_s30 }
  0x20   : > { %p1535_p10 = pnand %p1003_p9, %p1892_p1 }
  0x22   : > { %p1112_p12 = pneg %p1535_p10 }
  0x25   : > { %s1110_s22 = scalar_lea.hbm %s1915_s2, 256 }
  0x26   : > { %p1111_p11 = scmp.ne.s32.totalorder %s1915_s2, %s1110_s22  ;;  %p1117_p3 = scmp.lt.u32.totalorder %s1110_s22, %s1915_s2 }
  0x28   : > { %p1113_p13 = pnand %p1112_p12, %p1111_p11 }
  0x2a   : > { %p1114_p0 = pneg %p1113_p13 }
  0x2c   : > { %p1119_p5 = pnand %p1117_p3, %p1114_p0 }
  0x2e   : > { %1122 = shalt.err (!%p1119_p5)
}
  0x2f   : > { %s1123_s29 = scalar_lea.vmem %s330_s27, 256  ;;  %p1131_p2 = scmp.lt.s32.totalorder %s330_s27, %s330_s27 }
  0x30   : > { %p1124_p7 = scmp.ne.s32.totalorder %s330_s27, %s1123_s29  ;;  %p1132_p6 = scmp.lt.s32.totalorder %s1123_s29, %s1123_s29 }
  0x32   : > { %p1126_p9 = pnand %p1124_p7, %p1112_p12  ;;  %p1133_p4 = por %p1132_p6, %p1131_p2 }
  0x34   : > { %p1127_p1 = pneg %p1126_p9 }
  0x36   : > { %p1134_p8 = pnand %p1133_p4, %p1127_p1 }
  0x38   : > { %1137 = shalt.err (!%p1134_p8)
}
  0x39   : > { %s1400_s24 = smov 64   ;;  %s1401_s11 = smov 4  }
  0x3a   : > { %1006 = dma.hbm_to_vmem [thread:$0]  (!%p1535_p10), %s1915_s2, 256, %s330_s27, [#allocation6], %s1400_s24, %s1400_s24, %s1401_s11  }
  0x3b   : > { %s1916_s4 = sld [smem:[#allocation27_spill]] }
  0x41   : > { %s1138_s26 = scalar_lea.hbm %s1916_s4, 256 }
  0x42   : > { %p1139_p11 = scmp.ne.s32.totalorder %s1916_s4, %s1138_s26  ;;  %p1145_p4 = scmp.lt.u32.totalorder %s1138_s26, %s1916_s4 }
  0x44   : > { %p1141_p1 = pnand %p1139_p11, %p1112_p12 }
  0x46   : > { %p1142_p2 = pneg %p1141_p1 }
  0x48   : > { %p1147_p6 = pnand %p1145_p4, %p1142_p2 }
  0x4a   : > { %1150 = shalt.err (!%p1147_p6)
}
  0x4b   : > { %s1151_s27 = scalar_lea.vmem %s1539_s30, 256  ;;  %p1159_p3 = scmp.lt.s32.totalorder %s1539_s30, %s1539_s30 }
  0x4c   : > { %p1152_p8 = scmp.ne.s32.totalorder %s1539_s30, %s1151_s27  ;;  %p1160_p5 = scmp.lt.s32.totalorder %s1151_s27, %s1151_s27 }
  0x4e   : > { %p1154_p13 = pnand %p1152_p8, %p1112_p12  ;;  %p1161_p7 = por %p1160_p5, %p1159_p3 }
  0x50   : > { %p1155_p0 = pneg %p1154_p13 }
  0x52   : > { %p1162_p9 = pnand %p1161_p7, %p1155_p0 }
  0x54   : > { %1165 = shalt.err (!%p1162_p9)
}
  0x55   : > { %1009 = dma.hbm_to_vmem [thread:$0]  (!%p1535_p10), %s1916_s4, 256, %s1539_s30, [#allocation9], %s1400_s24, %s1400_s24, %s1401_s11  }
  0x56   : > { %s43_s9 = sadd.s32 1, %s1388_s18  ;;  %s46_s10 = sadd.s32 1, %s1392_s19 }
  0x57   : > { %p44_p12 = scmp.ge.s32.totalorder %s43_s9, 2  ;;  %s55_s28 = sadd.s32 1, %s1376_s15 }
  0x58   : > { %p62_p11 = scmp.ne.s32.totalorder %s1376_s15, %s1372_s14  ;;  %p63_p1 = scmp.eq.s32.totalorder %s1396_s20, 0 }
  0x59   : > { %s1951_s9 = smov (%p44_p12, %s43_s9), 0  ;;  %s1953_s10 = smov (!%p44_p12, %s46_s10), %s1392_s19 }
  0x5a   : > { %1917 = sst [smem:[#allocation22_spill]] %s1951_s9  ;;  %s51_s13 = ssub.s32 %s1388_s18, %s1951_s9 }
  0x5b   : > { %p1599_p2 = por %p63_p1, %p62_p11  ;;  %p48_p10 = scmp.ge.s32.totalorder %s1953_s10, 2 }
  0x5c   : > { %p1919_p4 = scmp.eq.s32.totalorder %s1506_s21, 3  ;;  %p1029_p8 = scmp.lt.s32.totalorder %s1396_s20, 4 }
  0x5d   : > { %s368_s24 = sand.u32 1, %s1376_s15   ;;  %s1955_s10 = smov (%p48_p10, %s1953_s10), 0 }
  0x5e   : > { %p1605_p6 = por %p1919_p4, %p62_p11  ;;  %1922 = sst [smem:[#allocation24_spill]] %s1955_s10 }
  0x5f   : > { %s1613_s11 = sshll.u32 %s368_s24, 3  ;;  %s50_s12 = ssub.s32 %s1392_s19, %s1955_s10 }
  0x60   : > { %s1920_s30 = scalar_select %p1605_p6, 1, 0 }
  0x61   : > { %s52_s26 = sor.u32 %s51_s13, %s50_s12  ;;  %s927_s29 = sshll.u32 %s1392_s19, 1 }
  0x62   : > { %1921 = sst [smem:[#allocation23_spill]] %s1920_s30  ;;  %p53_p13 = scmp.eq.s32.totalorder %s52_s26, 0 }
  0x63   : > { %s377_s27 = sadd.s32 %s1388_s18, %s927_s29  ;;  %s372_s8 = scalar_lea.vmem [#allocation2], %s1613_s11 }
  0x64   : > { %s928_s3 = sshll.u32 %s377_s27, 7  ;;  %s381_s2 = sshll.u32 %s372_s8, 4  ;;  %s1628_s2 = int_to_ptr.vmem [resolvable:$true] %s381_s2 }
  0x65   : > { %s1621_s4 = scalar_select %p53_p13, %s1376_s15, %s55_s28  }
  0x66   : > { %s1626_s5 = scalar_lea.hbm %s1877_s0, %s928_s3  ;;  %p1634_p0 = pnand %p1029_p8, %p1599_p2 }
  0x67   : > { %s1641_s9 = scalar_lea.hbm %s1878_s1, %s928_s3  ;;  %s388_s30 = sand.u32 1, %s1396_s20  }
  0x68   : > { %s369_s26 = scalar_lea.sflag [#allocation3], %s368_s24  ;;  %s1166_s29 = scalar_lea.hbm %s1626_s5, 128 }
  0x69   : > { %p1167_p3 = scmp.ne.s32.totalorder %s1626_s5, %s1166_s29  ;;  %p1168_p5 = pneg %p1634_p0 }
  0x6a   : > { %s1171_s8 = scalar_lea.hbm %s1877_s0, 512  ;;  %p1172_p12 = scmp.lt.u32.totalorder %s1626_s5, %s1877_s0 }
  0x6b   : > { %p1169_p7 = pnand %p1168_p5, %p1167_p3  ;;  %p1173_p11 = scmp.lt.u32.totalorder %s1171_s8, %s1166_s29 }
  0x6c   : > { %p1175_p2 = scmp.lt.u32.totalorder %s1166_s29, %s1626_s5 }
  0x6d   : > { %p1170_p9 = pneg %p1169_p7  ;;  %p1174_p1 = por %p1173_p11, %p1172_p12 }
  0x6f   : > { %p1176_p10 = por %p1175_p2, %p1174_p1 }
  0x71   : > { %p1177_p4 = pnand %p1176_p10, %p1170_p9 }
  0x73   : > { %1180 = shalt.err (!%p1177_p4)
}
  0x74   : > { %s1181_s24 = scalar_lea.vmem %s1628_s2, 128  ;;  %s1402_s3 = smov [#allocation2]  }
  0x75   : > { %p1182_p8 = scmp.ne.s32.totalorder %s1628_s2, %s1181_s24  ;;  %s1186_s28 = sshll.u32 %s1402_s3, 4  ;;  %s1187_s28 = int_to_ptr.vmem [resolvable:$false] %s1186_s28 }
  0x76   : > { %s1188_s10 = scalar_lea.vmem %s1187_s28, 256  ;;  %p1189_p7 = scmp.lt.s32.totalorder %s1628_s2, %s1187_s28 }
  0x77   : > { %p1184_p13 = pnand %p1182_p8, %p1168_p5  ;;  %p1190_p12 = scmp.lt.s32.totalorder %s1188_s10, %s1181_s24 }
  0x79   : > { %p1185_p3 = pneg %p1184_p13  ;;  %p1191_p11 = por %p1190_p12, %p1189_p7 }
  0x7b   : > { %p1192_p1 = pnand %p1191_p11, %p1185_p3 }
  0x7d   : > { %1195 = shalt.err (!%p1192_p1)
}
  0x7e   : > { %1013 = dma.hbm_to_vmem [thread:$0]  (!%p1634_p0), %s1626_s5, 128, %s1628_s2, %s369_s26  }
  0x7f   : > { %s392_s29 = scalar_lea.vmem [#allocation5], %s1613_s11  ;;  %s389_s27 = scalar_lea.sflag [#allocation6], %s388_s30 }
  0x80   : > { %s401_s22 = sshll.u32 %s392_s29, 4  ;;  %s1196_s8 = scalar_lea.hbm %s1641_s9, 128  ;;  %s402_s22 = int_to_ptr.vmem [resolvable:$true] %s401_s22 }
  0x81   : > { %p1197_p9 = scmp.ne.s32.totalorder %s1641_s9, %s1196_s8  ;;  %s1201_s3 = scalar_lea.hbm %s1878_s1, 512 }
  0x82   : > { %p1202_p4 = scmp.lt.u32.totalorder %s1641_s9, %s1878_s1  ;;  %p1203_p8 = scmp.lt.u32.totalorder %s1201_s3, %s1196_s8 }
  0x83   : > { %p1199_p2 = pnand %p1197_p9, %p1168_p5  ;;  %p1205_p3 = scmp.lt.u32.totalorder %s1196_s8, %s1641_s9 }
  0x84   : > { %p1204_p13 = por %p1203_p8, %p1202_p4 }
  0x85   : > { %p1200_p10 = pneg %p1199_p2 }
  0x86   : > { %p1206_p7 = por %p1205_p3, %p1204_p13 }
  0x88   : > { %p1207_p12 = pnand %p1206_p7, %p1200_p10 }
  0x8a   : > { %1210 = shalt.err (!%p1207_p12)
}
  0x8b   : > { %s1211_s2 = scalar_lea.vmem %s402_s22, 128  ;;  %s1403_s5 = smov [#allocation5]  }
  0x8c   : > { %p1212_p11 = scmp.ne.s32.totalorder %s402_s22, %s1211_s2  ;;  %s1216_s11 = sshll.u32 %s1403_s5, 4  ;;  %s1217_s11 = int_to_ptr.vmem [resolvable:$false] %s1216_s11 }
  0x8d   : > { %s1218_s30 = scalar_lea.vmem %s1217_s11, 256  ;;  %p1219_p2 = scmp.lt.s32.totalorder %s402_s22, %s1217_s11 }
  0x8e   : > { %p1214_p1 = pnand %p1212_p11, %p1168_p5  ;;  %p1220_p6 = scmp.lt.s32.totalorder %s1218_s30, %s1211_s2 }
  0x90   : > { %p1215_p9 = pneg %p1214_p1  ;;  %p1221_p4 = por %p1220_p6, %p1219_p2 }
  0x92   : > { %p1222_p8 = pnand %p1221_p4, %p1215_p9 }
  0x94   : > { %1225 = shalt.err (!%p1222_p8)
}
  0x95   : > { %1016 = dma.hbm_to_vmem [thread:$0]  (!%p1634_p0), %s1641_s9, 128, %s402_s22, %s389_s27  }
  0x96   : > { %p1924_p10 = scmp.ne.s32.totalorder %s1913_s25, 0 }
  0x97   : > { %s1694_s26 = sand.u32 (!%p1924_p10), 1, %s1372_s14   ;;  %p1925_p5 = scmp.ne.s32.totalorder (!%p1924_p10), %s1910_s23, 0 }
  0x98   : > { %410 = sbr.rel (%p1924_p10) target bundleno = 714 (0x2ca), region = 52  ;;  %s933_s29 = sshll.u32 (!%p1924_p10), %s1694_s26, 3 }
  0x99   : > { %s413_s8 = scalar_lea.sflag (!%p1924_p10), [#allocation3], %s1694_s26  ;;  %s416_s12 = scalar_lea.vmem (!%p1924_p10), [#allocation2], %s933_s29 }
  0x9f   : > { %1343 = dma.done.wait (%p1925_p5), %s413_s8, 128  }
  0xa0   : > { %1345 = vsyncadd (%p1925_p5), %s413_s8, 4294967168  ;;  %s421_s13 = sand.u32 1, %s1506_s21   ;;  %s1705_s9 = scalar_lea.vmem [#allocation5], %s933_s29 }
  0xa1   : > { %s422_s25 = scalar_lea.sflag [#allocation6], %s421_s13 }
  0xa2   : > { %1347 = dma.done.wait (%p1925_p5), %s422_s25, 128  }
  0xa3   : > { %1349 = vsyncadd (%p1925_p5), %s422_s25, 4294967168  ;;  %p1926_p6 = scmp.eq.s32.totalorder %s1506_s21, 0 }
  0xa5   : > { %1351 = dma.done.wait (%p1926_p6), [#allocation6], 256   ;;  %p1927_p0 = pmov %p1926_p6 }
  0xa7   : > { %1353 = vsyncadd (%p1927_p0), [#allocation6], 4294967040  ;;  %p1928_p13 = pmov %p1927_p0 }
  0xa8   : > { %p1929_p3 = pmov %p1927_p0 }
  0xa9   : > { %1355 = dma.done.wait (%p1928_p13), [#allocation9], 256  }
  0xaa   : > { %1357 = vsyncadd (%p1929_p3), [#allocation9], 4294967040  ;;  %vm490_vm0 = vcmask 261120   ;;  %v486_v0 = vld [vmem:[%s416_s12] sm:$0xff]  ;;  %v1104_v4 = vld [vmem:[#allocation8] sm:$0xff]   ;;  %v1404_v6 = vmov 0.0  }
  0xab   : > { %v491_v1 = vsel %vm490_vm0, %v486_v0, 0.0  ;;  %v494_v2 = vmul.f32 %v486_v0, %v486_v0  ;;  %v1105_v5 = vld [vmem:[#allocation7] sm:$0xff]   ;;  %977 = vmatprep.subr.bf16.mxu1 %v1404_v6  ;;  %969 = vmatprep.subr.bf16.mxu0 %v1404_v6  ;;  %v1106_v7 = vld [vmem:[#allocation8 + $0x8] sm:$0xff]   ;;  %v1107_v8 = vld [vmem:[#allocation7 + $0x8] sm:$0xff]   ;;  %vm1405_vm1 = vmmov 0   ;;  %s1930_s10 = sld [smem:[#allocation28_spill]] }
  0xac   : > { %492 = vadd.xlane.f32.xlu0 %v491_v1  ;;  %978 = vmatpush3.bf16.msra.mxu1 %v1104_v4  ;;  %v940_v19 = vld [vmem:[%s1883_s6] ss:$0 sm:$0xff]  ;;  %v487_v23 = vld [vmem:[%s1705_s9] sm:$0xff]  ;;  %s954_s2 = sshll.u32 %s1384_s17, 1  ;;  %s1735_s5 = sshll.u32 %s1694_s26, 2  ;;  %vm591_vm2 = vcmask 257024  }
  0xad   : > { %v495_v3 = vsel %vm490_vm0, %v494_v2, 0.0  ;;  %970 = vmatpush3.bf16.msra.mxu0 %v1105_v5  ;;  %979 = vmatprep.subr.bf16.mxu1 %v1404_v6  ;;  %v941_v21 = vld [vmem:[%s1884_s7] ss:$0 sm:$0xff]  ;;  %s1931_s29 = sld [smem:[#allocation26_spill]]  ;;  %s692_s8 = sadd.s32 %s1380_s16, %s954_s2 }
  0xae   : > { %971 = vmatprep.subr.bf16.mxu0 %v1404_v6  ;;  %981 = vmatprep.mubr.msk.bf16.mxu1 %vm1405_vm1, %v1404_v6  ;;  %s1741_s17 = sshll.u32 %s692_s8, 6  ;;  %s470_s12 = scalar_lea.vmem [#allocation10], %s1735_s5 }
  0xaf   : > { %973 = vmatprep.mubr.msk.bf16.mxu0 %vm1405_vm1, %v1404_v6  ;;  %s1932_s25 = sld [smem:[#allocation23_spill]]  ;;  %s696_s9 = sshll.u32 %s470_s12, 4  ;;  %s1754_s9 = int_to_ptr.vmem [resolvable:$true] %s696_s9 }
  0xb0   : > { %496 = vadd.xlane.f32.xlu0 %v495_v3  ;;  %980 = vmatpush3.bf16.msra.mxu1 %v1106_v7  ;;  %s484_s16 = scalar_lea.vmem [#allocation13], %s1735_s5  ;;  %s1406_s23 = smov 96  }
  0xb1   : > { %972 = vmatpush3.bf16.msra.mxu0 %v1107_v8  ;;  %v947_v28 = vld [vmem:[%s1930_s10] ss:$0 sm:$0xff]  ;;  %s1933_s24 = sld [smem:[#allocation29_spill]]  ;;  %s671_s28 = scalar_lea.sflag [#allocation4], %s1694_s26 }
  0xb2   : > { %s1226_s10 = scalar_lea.vmem %s1754_s9, 64  ;;  %s1407_s2 = smov [#allocation10]  }
  0xb3   : > { %v942_v30 = vld [vmem:[%s1931_s29] ss:$0 sm:$0xff]  ;;  %p1227_p7 = scmp.ne.s32.totalorder %s1754_s9, %s1226_s10  ;;  %s1230_s11 = sshll.u32 %s1407_s2, 4  ;;  %s1231_s11 = int_to_ptr.vmem [resolvable:$false] %s1230_s11 }
  0xb4   : > { %s1232_s30 = scalar_lea.vmem %s1231_s11, 128  ;;  %p1233_p9 = scmp.lt.s32.totalorder %s1754_s9, %s1231_s11 }
  0xb5   : > { %p1934_p12 = scmp.ne.s32.totalorder %s1932_s25, 0  ;;  %p1234_p2 = scmp.lt.s32.totalorder %s1232_s30, %s1226_s10 }
  0xb7   : > { %s1752_s3 = scalar_lea.hbm %s1933_s24, %s1741_s17  ;;  %p1228_p11 = pnand %p1227_p7, %p1934_p12 }
  0xb8   : > { %p1235_p4 = por %p1234_p2, %p1233_p9 }
  0xb9   : > { %p1229_p1 = pneg %p1228_p11 }
  0xbb   : > { %p1236_p8 = pnand %p1235_p4, %p1229_p1 }
 0x139   : > { %v493_v9 = vpop.xlane.xlu0 %492 }
 0x13a   : > { %v498_v10 = vmul.f32 0.03125, %v493_v9 }
 0x13c   : > { %v500_v12 = vmul.f32 %v498_v10, %v498_v10  ;;  %v503_v17 = vsub.f32 %v486_v0, %v498_v10 }
 0x13d   : > { %v497_v11 = vpop.xlane.xlu0 %496 }
 0x13e   : > { %v499_v13 = vmul.f32 0.03125, %v497_v11 }
 0x140   : > { %v501_v14 = vsub.f32 %v499_v13, %v500_v12 }
 0x142   : > { %v502_v15 = vmax.f32 %v501_v14, 0.0 }
 0x144   : > { %v504_v16 = vadd.f32 1e-05, %v502_v15 }
 0x146   : > { %1108 = vrsqrt.f32 %v504_v16 }
 0x150   : > { %v1109_v18 = vpop.eup %1108 }
 0x151   : > { %v506_v20 = vmul.f32 %v1109_v18, %v503_v17 }
 0x153   : > { %v513_v22 = vmul.f32 %v940_v19, %v506_v20 }
 0x155   : > { %v520_v24 = vadd.f32 %v941_v21, %v513_v22 }
 0x157   : > { %v601_v25 = vpack.c.bf16 %v520_v24, %v520_v24  ;;  %v521_v26 = vadd.f32 %v520_v24, %v487_v23 }
 0x159   : > { %982 = vmatmul.mubr.msk.bf16.vlgmr.msra.gmra.mrb[0].mxu1 %vm490_vm0, %v601_v25  ;;  %v522_v27 = vpack.c.bf16 %v521_v26, %v521_v26 }
 0x15b   : > { %974 = vmatmul.mubr.msk.bf16.vlgmr.msra.gmra.mrb[0].mxu0 %vm490_vm0, %v522_v27 }
 0x22c   : > { %v662_v29 = vpop.f32.mrb[0].mxu1 }
 0x22d   : > { %v663_v31 = vadd.f32 %v947_v28, %v662_v29  ;;  %v983_v32 = vpop.f32.mrb[1].mxu1 }
 0x22e   : > { %v583_v33 = vpop.f32.mrb[0].mxu0  ;;  %v665_v34 = vpop.f32.mrb[2].mxu1 }
 0x22f   : > { %v668_v35 = vpack.c.bf16 %v663_v31, %v663_v31  ;;  %v584_v36 = vadd.f32 %v942_v30, %v583_v33  ;;  %v975_v37 = vpop.f32.mrb[1].mxu0  ;;  %v984_v38 = vpop.f32.mrb[3].mxu1 }
 0x230   : > { %v586_v39 = vpop.f32.mrb[2].mxu0 }
 0x231   : > { %v589_v40 = vmul.f32 0.35355338, %v584_v36  ;;  %v976_v41 = vpop.f32.mrb[3].mxu0  ;;  %v962_v42 = vpack.c.bf16 %v584_v36, %v584_v36  ;;  %669 = vst.msk [vmem:[%s484_s16] sm:$0xf] %vm591_vm2, %v668_v35 }
 0x233   : > { %v590_v43 = vpack.c.bf16 %v589_v40, %v589_v40  ;;  %597 = vrot.lane.b32.xlu1 %v962_v42, %s1406_s23 }
 0x235   : > { %592 = vst.msk [vmem:[%s470_s12] sm:$0xf] %vm591_vm2, %v590_v43 }
 0x236   : > { %1239 = shalt.err (!%p1236_p8)
}
 0x237   : > { %s1240_s26 = scalar_lea.hbm %s1752_s3, 64  ;;  %s1244_s12 = scalar_lea.hbm %s1933_s24, 256 }
 0x238   : > { %p1241_p10 = scmp.ne.s32.totalorder %s1752_s3, %s1240_s26  ;;  %p1245_p0 = scmp.lt.u32.totalorder %s1752_s3, %s1933_s24 }
 0x239   : > { %p1246_p13 = scmp.lt.u32.totalorder %s1244_s12, %s1240_s26  ;;  %p1248_p7 = scmp.lt.u32.totalorder %s1240_s26, %s1752_s3 }
 0x23a   : > { %p1242_p5 = pnand %p1241_p10, %p1934_p12 }
 0x23b   : > { %p1247_p3 = por %p1246_p13, %p1245_p0 }
 0x23c   : > { %p1243_p6 = pneg %p1242_p5 }
 0x23d   : > { %p1249_p11 = por %p1248_p7, %p1247_p3 }
 0x23f   : > { %p1250_p1 = pnand %p1249_p11, %p1243_p6 }
 0x241   : > { %1253 = shalt.err (!%p1250_p1)
}
 0x242   : > { %997 = dma.vmem_to_hbm [thread:$0]  (%p1934_p12), %s1754_s9, 64, %s1752_s3, %s671_s28  }
 0x243   : > { %s477_s27 = scalar_lea.vmem [#allocation11], %s1735_s5  ;;  %s726_s2 = sshll.u32 %s484_s16, 4  ;;  %s1796_s2 = int_to_ptr.vmem [resolvable:$true] %s726_s2 }
 0x244   : > { %s711_s10 = sshll.u32 %s477_s27, 4  ;;  %s1935_s26 = sld [smem:[#allocation30_spill]]  ;;  %s1788_s10 = int_to_ptr.vmem [resolvable:$true] %s711_s10 }
 0x245   : > { %s1936_s23 = sld [smem:[#allocation31_spill]]  ;;  %s1801_s5 = scalar_lea.sflag [#allocation12], %s421_s13 }
 0x246   : > { %s1254_s9 = scalar_lea.vmem %s1788_s10, 64  ;;  %s1408_s16 = smov [#allocation11]  }
 0x247   : > { %p1255_p9 = scmp.ne.s32.totalorder %s1788_s10, %s1254_s9  ;;  %s1258_s3 = sshll.u32 %s1408_s16, 4  ;;  %s1259_s3 = int_to_ptr.vmem [resolvable:$false] %s1258_s3 }
 0x248   : > { %s1260_s28 = scalar_lea.vmem %s1259_s3, 128  ;;  %p1261_p8 = scmp.lt.s32.totalorder %s1788_s10, %s1259_s3 }
 0x249   : > { %p1256_p2 = pnand %p1255_p9, %p1934_p12  ;;  %p1262_p10 = scmp.lt.s32.totalorder %s1260_s28, %s1254_s9 }
 0x24a   : > { %s1786_s29 = scalar_lea.hbm %s1935_s26, %s1741_s17 }
 0x24b   : > { %s1794_s22 = scalar_lea.hbm %s1936_s23, %s1741_s17  ;;  %p1257_p4 = pneg %p1256_p2 }
 0x24c   : > { %p1263_p5 = por %p1262_p10, %p1261_p8 }
 0x24e   : > { %p1264_p6 = pnand %p1263_p5, %p1257_p4 }
 0x2a5   : > { %v598_v44 = vpop.permute.xlu1 %597 }
 0x2a6   : > { %600 = vst.msk [vmem:[%s477_s27] sm:$0xf] %vm591_vm2, %v598_v44 }
 0x2a7   : > { %1267 = shalt.err (!%p1264_p6)
}
 0x2a8   : > { %s1268_s21 = scalar_lea.hbm %s1786_s29, 64  ;;  %s1272_s27 = scalar_lea.hbm %s1935_s26, 256 }
 0x2a9   : > { %p1269_p0 = scmp.ne.s32.totalorder %s1786_s29, %s1268_s21  ;;  %p1273_p7 = scmp.lt.u32.totalorder %s1786_s29, %s1935_s26 }
 0x2aa   : > { %p1274_p11 = scmp.lt.u32.totalorder %s1272_s27, %s1268_s21  ;;  %p1276_p9 = scmp.lt.u32.totalorder %s1268_s21, %s1786_s29 }
 0x2ab   : > { %p1270_p13 = pnand %p1269_p0, %p1934_p12 }
 0x2ac   : > { %p1275_p1 = por %p1274_p11, %p1273_p7 }
 0x2ad   : > { %p1271_p3 = pneg %p1270_p13 }
 0x2ae   : > { %p1277_p2 = por %p1276_p9, %p1275_p1 }
 0x2b0   : > { %p1278_p4 = pnand %p1277_p2, %p1271_p3 }
 0x2b2   : > { %1281 = shalt.err (!%p1278_p4)
}
 0x2b3   : > { %998 = dma.vmem_to_hbm [thread:$0]  (%p1934_p12), %s1788_s10, 64, %s1786_s29, %s1801_s5  }
 0x2b4   : > { %s1282_s8 = scalar_lea.vmem %s1796_s2, 64  ;;  %s1409_s12 = smov [#allocation13]  }
 0x2b5   : > { %p1283_p8 = scmp.ne.s32.totalorder %s1796_s2, %s1282_s8  ;;  %s1286_s9 = sshll.u32 %s1409_s12, 4  ;;  %s1287_s9 = int_to_ptr.vmem [resolvable:$false] %s1286_s9 }
 0x2b6   : > { %s1288_s16 = scalar_lea.vmem %s1287_s9, 128  ;;  %p1289_p6 = scmp.lt.s32.totalorder %s1796_s2, %s1287_s9 }
 0x2b7   : > { %p1284_p10 = pnand %p1283_p8, %p1934_p12  ;;  %p1290_p0 = scmp.lt.s32.totalorder %s1288_s16, %s1282_s8 }
 0x2b9   : > { %p1285_p5 = pneg %p1284_p10  ;;  %p1291_p13 = por %p1290_p0, %p1289_p6 }
 0x2bb   : > { %p1292_p3 = pnand %p1291_p13, %p1285_p5 }
 0x2bd   : > { %1295 = shalt.err (!%p1292_p3)
}
 0x2be   : > { %s1296_s10 = scalar_lea.hbm %s1794_s22, 64  ;;  %s1300_s28 = scalar_lea.hbm %s1936_s23, 256 }
 0x2bf   : > { %p1297_p7 = scmp.ne.s32.totalorder %s1794_s22, %s1296_s10  ;;  %p1301_p9 = scmp.lt.u32.totalorder %s1794_s22, %s1936_s23 }
 0x2c0   : > { %p1302_p2 = scmp.lt.u32.totalorder %s1300_s28, %s1296_s10  ;;  %p1304_p8 = scmp.lt.u32.totalorder %s1296_s10, %s1794_s22 }
 0x2c1   : > { %p1298_p11 = pnand %p1297_p7, %p1934_p12 }
 0x2c2   : > { %p1303_p4 = por %p1302_p2, %p1301_p9 }
 0x2c3   : > { %p1299_p1 = pneg %p1298_p11 }
 0x2c4   : > { %p1305_p10 = por %p1304_p8, %p1303_p4 }
 0x2c6   : > { %p1306_p5 = pnand %p1305_p10, %p1299_p1 }
 0x2c8   : > { %1309 = shalt.err (!%p1306_p5)
}
 0x2c9   : > { %999 = dma.vmem_to_hbm [thread:$0]  (%p1934_p12), %s1796_s2, 64, %s1794_s22, %s1801_s5  }
 0x2ca PF: > { %s1937_s17 = sld [smem:[#allocation20_spill]]  ;;  %s1938_s27 = sld [smem:[#allocation21_spill]] }
 0x2cb   : > { %p1032_p6 = scmp.ge.s32.totalorder %s1396_s20, 2 }
 0x2d0   : > { %s738_s11 = sand.u32 1, %s1937_s17   ;;  %p1939_p0 = scmp.ne.s32.totalorder %s1938_s27, 0 }
 0x2d1   : > { %s739_s30 = scalar_lea.sflag [#allocation4], %s738_s11 }
 0x2d2   : > { %p1018_p13 = pnand %p1032_p6, %p1939_p0 }
 0x2d4   : > { %1359 = dma.done.wait (!%p1018_p13), %s739_s30, 64  }
 0x2d5   : > { %1361 = vsyncadd (!%p1018_p13), %s739_s30, 4294967232  ;;  %s1940_s8 = sadd.s32 4294967294, %s1396_s20  }
 0x2d6   : > { %s747_s12 = sand.u32 1, %s1940_s8  }
 0x2d7   : > { %s748_s9 = scalar_lea.sflag [#allocation12], %s747_s12 }
 0x2d8   : > { %1363 = dma.done.wait (!%p1018_p13), %s748_s9, 128  }
 0x2d9   : > { %1365 = vsyncadd (!%p1018_p13), %s748_s9, 4294967168  ;;  %s34_s20 = sadd.s32 1, %s1396_s20   ;;  %s1941_s25 = sld [smem:[#allocation22_spill]] }
 0x2da   : > { %p31_p12 = scmp.ge.s32.totalorder %s34_s20, 6   ;;  %s1942_s2 = sld [smem:[#allocation24_spill]] }
 0x2db   : > { %s1943_s13 = smov %s1372_s14  ;;  %s1944_s14 = smov %s1376_s15 }
 0x2dc   : > { %s1945_s15 = smov %s1621_s4  ;;  %s1946_s16 = smov %s1388_s18 }
 0x2dd   : > { %s1947_s17 = smov %s1392_s19  ;;  %33 = sbr.rel (!%p31_p12) target bundleno = 20 (0x14), region = 150 }
 0x2df   : > { %s1948_s18 = smov %s1941_s25 }
 0x2e0   : > { %s1949_s19 = smov %s1942_s2 }
 0x2e4   :  { %762 = vsyncpa [#allocation3], 1 }
 0x2e5   :  { %764 = vsyncpa [#allocation3 + $0x1], 1 }
 0x2e6   :  { %765 = vsyncpa [#allocation6], 1 }
 0x2e7   :  { %767 = vsyncpa [#allocation6 + $0x1], 1 }
 0x2e8   :  { %768 = vsyncpa [#allocation9], 1 }
 0x2e9   :  { %769 = vsyncpa [#allocation4], 1 }
 0x2ea   :  { %771 = vsyncpa [#allocation4 + $0x1], 1 }
 0x2eb   :  { %772 = vsyncpa [#allocation12], 1 }
 0x2ec   :  { %774 = vsyncpa [#allocation12 + $0x1], 1 }

</bundles_post_ra>
